<compile_context>
chip_gen: v6e
topology: v6e:2x2x1
jax: 0.10.0
libtpu: 0.0.40
codegen_flags: <defaults>
</compile_context>

<pallas_src>
import jax
import jax.numpy as jnp
from jax.experimental import pallas as pl
from jax.experimental.pallas import tpu as pltpu


def _round_up(n, m):
    return (n + m - 1) // m * m


# ----------------------------- Pallas kernel ------------------------------ #
def _chamfer_kernel(xT_ref, y_ref, ox_ref, oy_ref):
    i = pl.program_id(1)          # x-tile index
    j = pl.program_id(2)          # y-tile index (innermost grid axis)

    xT = xT_ref[0]                # (Dp, TX)  x coords, points on lanes
    yt = y_ref[0]                 # (TY, Dp)  y coords, points on sublanes
    ty = yt.shape[0]

    sq_x = jnp.sum(xT * xT, axis=0, keepdims=True)                 # (1, TX)
    sq_y = jnp.sum(yt * yt, axis=1, keepdims=True)                 # (TY, 1)
    cross = jnp.dot(yt, xT, preferred_element_type=jnp.float32)    # (TY, TX) on MXU
    dist = jnp.maximum(sq_y + sq_x - 2.0 * cross, 0.0)             # (TY, TX)

    # ---- per-x-point min over this y tile; accumulate across j (innermost) ----
    colmin = jnp.min(dist, axis=0, keepdims=True)                  # (1, TX)

    @pl.when(j == 0)
    def _():
        ox_ref[0] = colmin

    @pl.when(j > 0)
    def _():
        ox_ref[0] = jnp.minimum(ox_ref[0], colmin)

    # ---- per-y-point min over this x tile; accumulate across i into the
    #      batch-resident (1, Ny_pad, 1) output row (slice j of it) ----
    rowmin = jnp.min(dist, axis=1, keepdims=True)                  # (TY, 1)
    start = pl.multiple_of(j * ty, ty)

    @pl.when(i == 0)
    def _():
        oy_ref[0, pl.ds(start, ty), :] = rowmin

    @pl.when(i > 0)
    def _():
        oy_ref[0, pl.ds(start, ty), :] = jnp.minimum(
            oy_ref[0, pl.ds(start, ty), :], rowmin)


# ------------------------------ JAX wrapper -------------------------------- #
def _pairwise_min_dists(x, y, *, tx=256, ty=256, sentinel=1.0e6):
    """x: (B,Nx,D), y: (B,Ny,D) -> (min_j ||x_i-y_j||^2, min_i ||y_j-x_i||^2)."""
    B, Nx, D = x.shape
    By, Ny, Dy = y.shape
    assert B == By and D == Dy

    Dp = _round_up(max(D, 1), 8)          # coord dim padded to a sublane group
    Nxp = _round_up(Nx, tx)
    Nyp = _round_up(Ny, ty)

    # zero-pad coordinate dim (mathematically inert), sentinel-pad extra points
    # (distance from any real point to a sentinel point is ~8e12 -> never the min).
    xp = jnp.pad(x.astype(jnp.float32), ((0, 0), (0, 0), (0, Dp - D)))
    xp = jnp.pad(xp, ((0, 0), (0, Nxp - Nx), (0, 0)), constant_values=sentinel)
    yp = jnp.pad(y.astype(jnp.float32), ((0, 0), (0, 0), (0, Dp - D)))
    yp = jnp.pad(yp, ((0, 0), (0, Nyp - Ny), (0, 0)), constant_values=sentinel)

    xT = jnp.transpose(xp, (0, 2, 1))     # (B, Dp, Nxp): x points on lanes

    grid = (B, Nxp // tx, Nyp // ty)
    out_x, out_y = pl.pallas_call(
        _chamfer_kernel,
        out_shape=(
            jax.ShapeDtypeStruct((B, 1, Nxp), jnp.float32),   # per-x-point min
            jax.ShapeDtypeStruct((B, Nyp, 1), jnp.float32),   # per-y-point min
        ),
        grid_spec=pltpu.PrefetchScalarGridSpec(
            num_scalar_prefetch=0,
            grid=grid,
            in_specs=[
                pl.BlockSpec((1, Dp, tx), lambda b, i, j: (b, 0, i)),   # xT
                pl.BlockSpec((1, ty, Dp), lambda b, i, j: (b, j, 0)),   # y
            ],
            out_specs=[
                pl.BlockSpec((1, 1, tx), lambda b, i, j: (b, 0, i)),    # resident over j
                pl.BlockSpec((1, Nyp, 1), lambda b, i, j: (b, 0, 0)),   # resident over i, j
            ],
        ),
        compiler_params=pltpu.CompilerParams(
            dimension_semantics=("parallel", "arbitrary", "arbitrary"),
        ),
    )(xT, yp)

    return out_x[:, 0, :Nx], out_y[:, :Ny, 0]          # (B, Nx), (B, Ny)


def chamfer_loss(x, y, *, tx=256, ty=256):
    """ChamferLoss.forward: x (B, Nx, D), y (B, Ny, D) -> scalar."""
    d_x, d_y = _pairwise_min_dists(x, y, tx=tx, ty=ty)
    cham_x = jnp.mean(d_x, axis=1)     # mean over x points of min-dist-to-y
    cham_y = jnp.mean(d_y, axis=1)     # mean over y points of min-dist-to-x
    return jnp.mean(jnp.maximum(cham_x, cham_y))


def chamfer_loss_ref(x, y):
    """Pure-JAX reference mirroring the PyTorch ChamferDistance exactly."""
    d = jnp.sum((x[:, None, :, :] - y[:, :, None, :]) ** 2, axis=-1)   # (B, Ny, Nx)
    row = jnp.min(d, axis=1)           # per-x-point min
    col = jnp.min(d, axis=2)           # per-y-point min
    return jnp.mean(jnp.maximum(jnp.mean(row, axis=1), jnp.mean(col, axis=1)))


# ---------------------------------- main ----------------------------------- #
if __name__ == "__main__":
    key = jax.random.PRNGKey(0)
    kx, ky = jax.random.split(key)

    B, Nx, Ny, D = 2, 1000, 700, 3
    x = jax.random.normal(kx, (B, Nx, D), dtype=jnp.float32)
    y = 0.5 * jax.random.normal(ky, (B, Ny, D), dtype=jnp.float32) + 0.1

    loss = jax.block_until_ready(chamfer_loss(x, y))
    ref = jax.block_until_ready(chamfer_loss_ref(x, y))

    assert loss.shape == (), loss.shape
    assert bool(jnp.isfinite(loss))
    assert abs(float(loss) - float(ref)) <= 1e-3 * max(1.0, abs(float(ref))), (
        float(loss), float(ref))
    print("KERNEL_OK")
</pallas_src>

<mosaic_0001>
module attributes {stable_mosaic.version = 11 : i64} {
  func.func @_chamfer_kernel(%arg0: i32, %arg1: i32, %arg2: i32, %arg3: memref<1x8x256xf32, #tpu.memory_space<vmem>>, %arg4: memref<1x256x8xf32, #tpu.memory_space<vmem>>, %arg5: memref<1x1x256xf32, #tpu.memory_space<vmem>>, %arg6: memref<1x768x1xf32, #tpu.memory_space<vmem>>) attributes {dimension_semantics = [#tpu.dimension_semantics<parallel>, #tpu.dimension_semantics<arbitrary>, #tpu.dimension_semantics<arbitrary>], iteration_bounds = array<i64: 2, 4, 3>, scalar_prefetch = 0 : i64, scratch_operands = 0 : i64, tpu.core_type = #tpu.core_type<tc>, window_params = [{transform_indices = @transform_0, window_bounds = array<i64: 1, 8, 256>}, {transform_indices = @transform_1, window_bounds = array<i64: 1, 256, 8>}, {transform_indices = @transform_2, window_bounds = array<i64: 1, 1, 256>}, {transform_indices = @transform_3, window_bounds = array<i64: 1, 768, 1>}]} {
    %c0 = arith.constant 0 : index
    %c0_0 = arith.constant 0 : index
    %c0_1 = arith.constant 0 : index
    %0 = vector.load %arg3[%c0, %c0_0, %c0_1] : memref<1x8x256xf32, #tpu.memory_space<vmem>>, vector<1x8x256xf32>
    %1 = vector.shape_cast %0 : vector<1x8x256xf32> to vector<8x256xf32>
    %c0_2 = arith.constant 0 : index
    %c0_3 = arith.constant 0 : index
    %c0_4 = arith.constant 0 : index
    %2 = vector.load %arg4[%c0_2, %c0_3, %c0_4] : memref<1x256x8xf32, #tpu.memory_space<vmem>>, vector<1x256x8xf32>
    %3 = vector.shape_cast %2 : vector<1x256x8xf32> to vector<256x8xf32>
    %4 = arith.mulf %1, %1 : vector<8x256xf32>
    %cst = arith.constant dense<0.000000e+00> : vector<256xf32>
    %5 = vector.multi_reduction <add>, %4, %cst [0] : vector<8x256xf32> to vector<256xf32>
    %6 = vector.shape_cast %5 : vector<256xf32> to vector<1x256xf32>
    %7 = arith.mulf %3, %3 : vector<256x8xf32>
    %cst_5 = arith.constant dense<0.000000e+00> : vector<256xf32>
    %8 = vector.multi_reduction <add>, %7, %cst_5 [1] : vector<256x8xf32> to vector<256xf32>
    %9 = vector.shape_cast %8 : vector<256xf32> to vector<256x1xf32>
    %cst_6 = arith.constant dense<0.000000e+00> : vector<256x256xf32>
    %10 = tpu.matmul %3, %1, %cst_6 {dimension_numbers = #tpu.dot_dimension_numbers<[1], [0], [0], [1], [0, 0, 1, 1], [], []>} : vector<256x8xf32>, vector<8x256xf32>, vector<256x256xf32> -> vector<256x256xf32>
    %11 = vector.broadcast %9 : vector<256x1xf32> to vector<256x256xf32>
    %12 = vector.broadcast %6 : vector<1x256xf32> to vector<256x256xf32>
    %13 = arith.addf %11, %12 : vector<256x256xf32>
    %cst_7 = arith.constant 2.000000e+00 : f32
    %14 = vector.broadcast %cst_7 : f32 to vector<256x256xf32>
    %15 = arith.mulf %14, %10 : vector<256x256xf32>
    %16 = arith.subf %13, %15 : vector<256x256xf32>
    %cst_8 = arith.constant 0.000000e+00 : f32
    %17 = vector.broadcast %cst_8 : f32 to vector<256x256xf32>
    %18 = arith.maximumf %16, %17 : vector<256x256xf32>
    %cst_9 = arith.constant dense<0x7F800000> : vector<256xf32>
    %19 = vector.multi_reduction <minimumf>, %18, %cst_9 [0] : vector<256x256xf32> to vector<256xf32>
    %20 = vector.shape_cast %19 : vector<256xf32> to vector<1x256xf32>
    %c0_i32 = arith.constant 0 : i32
    %21 = arith.cmpi eq, %arg2, %c0_i32 : i32
    %22 = arith.extui %21 : i1 to i32
    %c0_i32_10 = arith.constant 0 : i32
    %23 = arith.cmpi ne, %22, %c0_i32_10 : i32
    scf.if %23 {
      %c0_18 = arith.constant 0 : index
      %c0_19 = arith.constant 0 : index
      %c0_20 = arith.constant 0 : index
      %37 = vector.load %arg5[%c0_18, %c0_19, %c0_20] : memref<1x1x256xf32, #tpu.memory_space<vmem>>, vector<1x1x256xf32>
      %38 = vector.shape_cast %37 : vector<1x1x256xf32> to vector<1x256xf32>
      %39 = vector.shape_cast %20 : vector<1x256xf32> to vector<1x1x256xf32>
      tpu.vector_store %arg5[%c0_18, %c0_19, %c0_20], %39 {strides = array<i32>} : memref<1x1x256xf32, #tpu.memory_space<vmem>>, vector<1x1x256xf32>,
    } else {
    }
    %c0_i32_11 = arith.constant 0 : i32
    %24 = arith.cmpi sgt, %arg2, %c0_i32_11 : i32
    %25 = arith.extui %24 : i1 to i32
    %c0_i32_12 = arith.constant 0 : i32
    %26 = arith.cmpi ne, %25, %c0_i32_12 : i32
    scf.if %26 {
      %c0_18 = arith.constant 0 : index
      %c0_19 = arith.constant 0 : index
      %c0_20 = arith.constant 0 : index
      %37 = vector.load %arg5[%c0_18, %c0_19, %c0_20] : memref<1x1x256xf32, #tpu.memory_space<vmem>>, vector<1x1x256xf32>
      %38 = vector.shape_cast %37 : vector<1x1x256xf32> to vector<1x256xf32>
      %39 = arith.minimumf %38, %20 : vector<1x256xf32>
      %c0_21 = arith.constant 0 : index
      %c0_22 = arith.constant 0 : index
      %c0_23 = arith.constant 0 : index
      %40 = vector.load %arg5[%c0_21, %c0_22, %c0_23] : memref<1x1x256xf32, #tpu.memory_space<vmem>>, vector<1x1x256xf32>
      %41 = vector.shape_cast %40 : vector<1x1x256xf32> to vector<1x256xf32>
      %42 = vector.shape_cast %39 : vector<1x256xf32> to vector<1x1x256xf32>
      tpu.vector_store %arg5[%c0_21, %c0_22, %c0_23], %42 {strides = array<i32>} : memref<1x1x256xf32, #tpu.memory_space<vmem>>, vector<1x1x256xf32>,
    } else {
    }
    %cst_13 = arith.constant dense<0x7F800000> : vector<256xf32>
    %27 = vector.multi_reduction <minimumf>, %18, %cst_13 [1] : vector<256x256xf32> to vector<256xf32>
    %28 = vector.shape_cast %27 : vector<256xf32> to vector<256x1xf32>
    %c256_i32 = arith.constant 256 : i32
    %29 = arith.muli %arg2, %c256_i32 : i32
    %30 = tpu.assume_multiple %29, 256 : i32
    %c0_i32_14 = arith.constant 0 : i32
    %31 = arith.cmpi eq, %arg1, %c0_i32_14 : i32
    %32 = arith.extui %31 : i1 to i32
    %c0_i32_15 = arith.constant 0 : i32
    %33 = arith.cmpi ne, %32, %c0_i32_15 : i32
    scf.if %33 {
      %c0_18 = arith.constant 0 : index
      %37 = arith.index_cast %30 : i32 to index
      %c0_19 = arith.constant 0 : index
      %38 = vector.load %arg6[%c0_18, %37, %c0_19] : memref<1x768x1xf32, #tpu.memory_space<vmem>>, vector<1x256x1xf32>
      %39 = vector.shape_cast %38 : vector<1x256x1xf32> to vector<256x1xf32>
      %40 = vector.shape_cast %28 : vector<256x1xf32> to vector<1x256x1xf32>
      tpu.vector_store %arg6[%c0_18, %37, %c0_19], %40 {strides = array<i32>} : memref<1x768x1xf32, #tpu.memory_space<vmem>>, vector<1x256x1xf32>,
    } else {
    }
    %c0_i32_16 = arith.constant 0 : i32
    %34 = arith.cmpi sgt, %arg1, %c0_i32_16 : i32
    %35 = arith.extui %34 : i1 to i32
    %c0_i32_17 = arith.constant 0 : i32
    %36 = arith.cmpi ne, %35, %c0_i32_17 : i32
    scf.if %36 {
      %c0_18 = arith.constant 0 : index
      %37 = arith.index_cast %30 : i32 to index
      %c0_19 = arith.constant 0 : index
      %38 = vector.load %arg6[%c0_18, %37, %c0_19] : memref<1x768x1xf32, #tpu.memory_space<vmem>>, vector<1x256x1xf32>
      %39 = vector.shape_cast %38 : vector<1x256x1xf32> to vector<256x1xf32>
      %40 = arith.minimumf %39, %28 : vector<256x1xf32>
      %c0_20 = arith.constant 0 : index
      %41 = arith.index_cast %30 : i32 to index
      %c0_21 = arith.constant 0 : index
      %42 = vector.load %arg6[%c0_20, %41, %c0_21] : memref<1x768x1xf32, #tpu.memory_space<vmem>>, vector<1x256x1xf32>
      %43 = vector.shape_cast %42 : vector<1x256x1xf32> to vector<256x1xf32>
      %44 = vector.shape_cast %40 : vector<256x1xf32> to vector<1x256x1xf32>
      tpu.vector_store %arg6[%c0_20, %41, %c0_21], %44 {strides = array<i32>} : memref<1x768x1xf32, #tpu.memory_space<vmem>>, vector<1x256x1xf32>,
    } else {
    }
    return
  }
  func.func @transform_0(%arg0: i32, %arg1: i32, %arg2: i32) -> (i32, i32, i32) {
    %c0_i32 = arith.constant 0 : i32
    %c0_i32_0 = arith.constant 0 : i32
    return %arg0, %c0_i32, %arg1 : i32, i32, i32
  }
  func.func @transform_1(%arg0: i32, %arg1: i32, %arg2: i32) -> (i32, i32, i32) {
    %c0_i32 = arith.constant 0 : i32
    %c0_i32_0 = arith.constant 0 : i32
    return %arg0, %arg2, %c0_i32 : i32, i32, i32
  }
  func.func @transform_2(%arg0: i32, %arg1: i32, %arg2: i32) -> (i32, i32, i32) {
    %c0_i32 = arith.constant 0 : i32
    %c0_i32_0 = arith.constant 0 : i32
    return %arg0, %c0_i32, %arg1 : i32, i32, i32
  }
  func.func @transform_3(%arg0: i32, %arg1: i32, %arg2: i32) -> (i32, i32, i32) {
    %c0_i32 = arith.constant 0 : i32
    %c0_i32_0 = arith.constant 0 : i32
    %c0_i32_1 = arith.constant 0 : i32
    return %arg0, %c0_i32, %c0_i32_0 : i32, i32, i32
  }
}

</mosaic_0001>

<bundles_post_ra>
// kernel: tpu_custom_call.1
= control target key start
LH: loop header
LB: loop body
LE: loop exit
PB: predicated region body
PF: predicated region fallthrough
CT: control target
= control target key end

     0   :  { %9 = vsyncpa [#allocation3], 0  ;;  %s3061_s0 = inlined_call_operand.vmem [shape: f32[2,8,1024], index: 0, kind: input, shape index: {}]   ;;  %s3062_s1 = inlined_call_operand.vmem [shape: f32[2,768,8], index: 1, kind: input, shape index: {}]   ;;  %s3063_s2 = inlined_call_operand.hbm [shape: f32[2,1,1024], index: 2, kind: output, shape index: {0}]   ;;  %s3064_s3 = inlined_call_operand.vmem [shape: f32[2,768,1], index: 3, kind: output, shape index: {1}]  }
   0x1   :  { %11 = vsyncpa [#allocation3 + $0x1], 0  ;;  %s1849_s12 = smov 0   ;;  %s1851_s13 = smov 0  }
   0x2   :  { %s1853_s14 = smov 0   ;;  %s1855_s15 = smov 0  }
   0x3   :  { %s1857_s16 = smov 0   ;;  %s1859_s17 = smov 0  }
   0x4   :  { %s1861_s18 = smov 0   ;;  %s1863_s19 = smov 0  }
   0x5   :  { %s1865_s20 = smov 0   ;;  %s1867_s21 = smov 0  }
   0x6 LB: > { %3095 = sst [smem:[#allocation5_spill]] %s1815_s19  ;;  %s1566_s22 = sadd.s32 4294967295, %s1823_s21   ;;  %s1823_s21 = sphi %s1867_s21, %s17_s21   ;;  %s1819_s20 = sphi %s1865_s20, %s3199_s20   ;;  %s1815_s19 = sphi %s1863_s19, %s3198_s19   ;;  %s1811_s18 = sphi %s1861_s18, %s3204_s18   ;;  %s1807_s17 = sphi %s1859_s17, %s3196_s17   ;;  %s1803_s16 = sphi %s1857_s16, %s3195_s16   ;;  %s1799_s15 = sphi %s1855_s15, %s3203_s15   ;;  %s1795_s14 = sphi %s1853_s14, %s3202_s14   ;;  %s1791_s13 = sphi %s1851_s13, %s3201_s13   ;;  %s1787_s12 = sphi %s1849_s12, %s3200_s12  }
   0x7   : > { %3096 = sst [smem:[#allocation6_spill]] %s1819_s20  ;;  %s1567_s23 = sadd.s32 4294967294, %s1823_s21  }
   0x8   : > { %s29_s24 = sadd.s32 1, %s1811_s18  ;;  %s32_s25 = sadd.s32 1, %s1815_s19 }
   0x9   : > { %p30_p0 = scmp.ge.s32.totalorder %s29_s24, 3  ;;  %s36_s26 = sadd.s32 1, %s1819_s20 }
   0xa   : > { %p111_p1 = scmp.ne.s32.totalorder %s1795_s14, %s1791_s13  ;;  %p112_p2 = scmp.eq.s32.totalorder %s1566_s22, 23 }
   0xb   : > { %s3206_s24 = smov (%p30_p0, %s29_s24), 0  ;;  %s3208_s25 = smov (!%p30_p0, %s32_s25), %s1815_s19 }
   0xc   : > { %3097 = sst [smem:[#allocation7_spill]] %s3206_s24  ;;  %p117_p3 = scmp.ne.s32.totalorder %s1791_s13, %s1787_s12 }
   0xd   : > { %p34_p4 = scmp.ge.s32.totalorder %s3208_s25, 4  ;;  %p118_p5 = scmp.eq.s32.totalorder %s1567_s23, 23 }
   0xe   : > { %p1911_p6 = por %p112_p2, %p111_p1  ;;  %p1570_p8 = scmp.ge.s32.totalorder %s1823_s21, 1 }
   0xf   : > { %s3210_s25 = smov (%p34_p4, %s3208_s25), 0  ;;  %s3212_s26 = smov (!%p34_p4, %s36_s26), %s1819_s20 }
  0x10   : > { %3099 = sst [smem:[#allocation8_spill]] %s3210_s25  ;;  %p1918_p7 = por %p118_p5, %p117_p3 }
  0x11   : > { %p38_p9 = scmp.ge.s32.totalorder %s3212_s26, 2  ;;  %p188_p10 = scmp.lt.s32.totalorder %s1823_s21, 25 }
  0x12   : > { %s97_s29 = ssub.s32 %s1815_s19, %s3210_s25  ;;  %s101_s5 = sadd.s32 1, %s1795_s14 }
  0x13   : > { %s3214_s26 = smov (%p38_p9, %s3212_s26), 0  ;;  %p189_p11 = pnand %p1570_p8, %p188_p10 }
  0x14   : > { %3101 = sst [smem:[#allocation9_spill]] %s3214_s26  ;;  %s96_s30 = ssub.s32 %s1819_s20, %s3214_s26 }
  0x15   : > { %s98_s4 = sor.u32 %s97_s29, %s96_s30  ;;  %192 = sbr.rel (%p189_p11) target bundleno = 624 (0x270), region = 28 }
  0x16   : > { %p99_p12 = scmp.eq.s32.totalorder %s98_s4, 0 }
  0x18   : > { %s1932_s6 = scalar_select %p99_p12, %s1795_s14, %s101_s5  }
  0x1a   : > { %s3066_s7 = sand.u32 1, %s1791_s13   ;;  %s1936_s8 = sshll.u32 %s1803_s16, 1  ;;  %v1825_v0 = vmov 0.0   ;;  %vm336_vm0 = vcmask 64512  }
  0x1b   : > { %s1940_s9 = sshll.u32 %s3066_s7, 1  ;;  %p231_p13 = scmp.lt.s32.totalorder %s1807_s17, 1  ;;  %593 = vmatprep.mubr.f32.mxu0 %v1825_v0  ;;  %689 = vmatprep.mubr.f32.mxu1 %v1825_v0 }
  0x1c   : > { %p233_p0 = scmp.lt.s32.totalorder %s1936_s8, 7  ;;  %s1575_s23 = sshll.u32 %s1799_s15, 5 }
  0x1d   : > { %s232_s10 = scalar_select %p231_p13, %s1807_s17, 1 }
  0x1e   : > { %s234_s11 = scalar_select %p233_p0, %s1936_s8, 7 }
  0x1f   : > { %s1573_s22 = sshll.u32 %s232_s10, 3  ;;  %p243_p1 = scmp.lt.s32.totalorder %s1575_s23, 95 }
  0x20   : > { %s236_s29 = sadd.s32 %s1573_s22, %s234_s11  ;;  %s1623_s4 = smul.u32 96, %s232_s10 }
  0x21   : > { %s1574_s30 = sshll.u32 %s236_s29, 3  ;;  %s1624_s25 = smul.u32 768, %s232_s10 }
  0x22   : > { %s238_s7 = scalar_lea.vmem %s3061_s0, %s1574_s30  ;;  %s3216_s23 = smov (!%p243_p1, %s1575_s23), 95 }
  0x23   : > { %v1952_v1 = vld [vmem:[%s238_s7 + $0x8] sm:$0xff]  ;;  %v1954_v2 = vld [vmem:[%s238_s7] sm:$0xff]  ;;  %s1959_s19 = scalar_lea.vmem %s3064_s3, %s1624_s25  ;;  %s246_s11 = sadd.s32 %s1623_s4, %s3216_s23 }
  0x24   : > { %559 = vmatprep.subr.mxu0 %v1952_v1  ;;  %1621 = vmatprep.subr.mxu1 %v1952_v1  ;;  %s1576_s26 = sshll.u32 %s246_s11, 3  ;;  %s2635_s20 = scalar_lea.vmem [#allocation2], %s1940_s9 }
  0x25   : > { %560 = vmatpush1.msra.mxu0 %v1954_v2  ;;  %1622 = vmatpush1.msra.mxu1 %v1954_v2  ;;  %s1968_s7 = scalar_lea.vmem %s3062_s1, %s1576_s26  ;;  %p1610_p2 = scmp.ne.s32.totalorder %s1799_s15, 0 }
  0x26   : > { %v258_v3 = vld [vmem:[%s1968_s7] sm:$0xff]  ;;  %v259_v4 = vld [vmem:[%s1968_s7 + $0x8] sm:$0xff]  ;;  %v260_v5 = vld [vmem:[%s1968_s7 + $0x10] sm:$0xff] }
  0x27   : > { %1578 = vmatmul.mubr.msk.f32.vlgmr.msra.gmra.mxu0 %vm336_vm0, %v258_v3  ;;  %v261_v6 = vld [vmem:[%s1968_s7 + $0x18] sm:$0xff]  ;;  %v1976_v7 = vld [vmem:[%s1968_s7 + $0x80] sm:$0xff]  ;;  %v304_v8 = vmul.f32 %v258_v3, %v258_v3  ;;  %v306_v9 = vmul.f32 %v260_v5, %v260_v5  ;;  %v305_v10 = vmul.f32 %v259_v4, %v259_v4  ;;  %v1983_v12 = vld [vmem:[%s1968_s7 + $0x88] sm:$0xff] }
  0x28   : > { %599 = vmatprep.mubr.f32.mxu0 %v1825_v0  ;;  %1594 = vmatmul.mubr.msk.f32.vlgmr.msra.gmra.mxu1 %vm336_vm0, %v1976_v7  ;;  %v307_v11 = vmul.f32 %v261_v6, %v261_v6  ;;  %v262_v15 = vld [vmem:[%s1968_s7 + $0x20] sm:$0xff]  ;;  %v263_v16 = vld [vmem:[%s1968_s7 + $0x28] sm:$0xff]  ;;  %v1997_v21 = vld [vmem:[%s1968_s7 + $0x90] sm:$0xff]  ;;  %v320_v59 = vmul.f32 %v1976_v7, %v1976_v7  ;;  %v321_v60 = vmul.f32 %v1983_v12, %v1983_v12 }
  0x29   : > { %695 = vmatprep.mubr.f32.mxu1 %v1825_v0  ;;  %v337_v13 = vsel %vm336_vm0, %v304_v8, 0.0  ;;  %v343_v14 = vsel %vm336_vm0, %v306_v9, 0.0  ;;  %v340_v17 = vsel %vm336_vm0, %v305_v10, 0.0  ;;  %v308_v19 = vmul.f32 %v262_v15, %v262_v15  ;;  %v264_v22 = vld [vmem:[%s1968_s7 + $0x30] sm:$0xff]  ;;  %v2001_v23 = vld [vmem:[%s1968_s7 + $0x38] sm:$0xff]  ;;  %v2016_v29 = vld [vmem:[%s1968_s7 + $0x40] sm:$0xff] }
  0x2a   : > { %338 = vadd.xlane.f32.xlu0 %v337_v13  ;;  %344 = vadd.xlane.f32.xlu1 %v343_v14  ;;  %v346_v18 = vsel %vm336_vm0, %v307_v11, 0.0  ;;  %v309_v20 = vmul.f32 %v263_v16, %v263_v16  ;;  %v310_v26 = vmul.f32 %v264_v22, %v264_v22  ;;  %v311_v27 = vmul.f32 %v2001_v23, %v2001_v23  ;;  %v2013_v28 = vld [vmem:[%s1968_s7 + $0x98] sm:$0xff]  ;;  %v2019_v30 = vld [vmem:[%s1968_s7 + $0x48] sm:$0xff]  ;;  %v2033_v35 = vld [vmem:[%s1968_s7 + $0xa0] sm:$0xff] }
  0x2b   : > { %1579 = vmatmul.mubr.msk.f32.gmra.mxu0 %vm336_vm0, %v259_v4  ;;  %v349_v24 = vsel %vm336_vm0, %v308_v19, 0.0  ;;  %v312_v33 = vmul.f32 %v2016_v29, %v2016_v29  ;;  %v313_v34 = vmul.f32 %v2019_v30, %v2019_v30  ;;  %v2036_v36 = vld [vmem:[%s1968_s7 + $0x50] sm:$0xff]  ;;  %v2039_v37 = vld [vmem:[%s1968_s7 + $0x58] sm:$0xff]  ;;  %v279_v42 = vld [vmem:[%s1968_s7 + $0xa8] sm:$0xff]  ;;  %v385_v62 = vsel %vm336_vm0, %v320_v59, 0.0 }
  0x2c   : > { %605 = vmatprep.mubr.f32.mxu0 %v1825_v0  ;;  %1595 = vmatmul.mubr.msk.f32.gmra.mxu1 %vm336_vm0, %v1983_v12  ;;  %v352_v25 = vsel %vm336_vm0, %v309_v20, 0.0  ;;  %v355_v31 = vsel %vm336_vm0, %v310_v26, 0.0  ;;  %v358_v32 = vsel %vm336_vm0, %v311_v27, 0.0  ;;  %v314_v40 = vmul.f32 %v2036_v36, %v2036_v36  ;;  %v2054_v43 = vld [vmem:[%s1968_s7 + $0x60] sm:$0xff]  ;;  %v2057_v44 = vld [vmem:[%s1968_s7 + $0x68] sm:$0xff]  ;;  %v2069_v49 = vld [vmem:[%s1968_s7 + $0x70] sm:$0xff] }
  0x2d   : > { %701 = vmatprep.mubr.f32.mxu1 %v1825_v0  ;;  %v361_v38 = vsel %vm336_vm0, %v312_v33, 0.0  ;;  %v364_v39 = vsel %vm336_vm0, %v313_v34, 0.0  ;;  %v315_v41 = vmul.f32 %v2039_v37, %v2039_v37  ;;  %v316_v47 = vmul.f32 %v2054_v43, %v2054_v43  ;;  %v2072_v50 = vld [vmem:[%s1968_s7 + $0x78] sm:$0xff]  ;;  %v280_v51 = vld [vmem:[%s1968_s7 + $0xb0] sm:$0xff]  ;;  %v282_v61 = vld [vmem:[%s1968_s7 + $0xc0] sm:$0xff] }
  0x2e   : > { %341 = vadd.xlane.f32.xlu0 %v340_v17  ;;  %347 = vadd.xlane.f32.xlu1 %v346_v18  ;;  %v367_v45 = vsel %vm336_vm0, %v314_v40, 0.0  ;;  %v317_v48 = vmul.f32 %v2057_v44, %v2057_v44  ;;  %v318_v54 = vmul.f32 %v2069_v49, %v2069_v49  ;;  %v319_v55 = vmul.f32 %v2072_v50, %v2072_v50  ;;  %v281_v56 = vld [vmem:[%s1968_s7 + $0xb8] sm:$0xff]  ;;  %v284_v10 = vld [vmem:[%s1968_s7 + $0xd0] sm:$0xff]  ;;  %v286_v20 = vld [vmem:[%s1968_s7 + $0xe0] sm:$0xff] }
  0x2f   : > { %1580 = vmatmul.mubr.msk.f32.gmra.mxu0 %vm336_vm0, %v260_v5  ;;  %v370_v46 = vsel %vm336_vm0, %v315_v41, 0.0  ;;  %v373_v52 = vsel %vm336_vm0, %v316_v47, 0.0  ;;  %v388_v63 = vsel %vm336_vm0, %v321_v60, 0.0  ;;  %v322_v3 = vmul.f32 %v1997_v21, %v1997_v21  ;;  %v283_v5 = vld [vmem:[%s1968_s7 + $0xc8] sm:$0xff] }
  0x30   : > { %611 = vmatprep.mubr.f32.mxu0 %v1825_v0  ;;  %1596 = vmatmul.mubr.msk.f32.gmra.mxu1 %vm336_vm0, %v1997_v21  ;;  %v376_v53 = vsel %vm336_vm0, %v317_v48, 0.0  ;;  %v379_v57 = vsel %vm336_vm0, %v318_v54, 0.0  ;;  %v382_v58 = vsel %vm336_vm0, %v319_v55, 0.0  ;;  %v323_v4 = vmul.f32 %v2013_v28, %v2013_v28 }
  0x31   : > { %707 = vmatprep.mubr.f32.mxu1 %v1825_v0  ;;  %v324_v8 = vmul.f32 %v2033_v35, %v2033_v35  ;;  %v325_v9 = vmul.f32 %v279_v42, %v279_v42  ;;  %v326_v13 = vmul.f32 %v280_v51, %v280_v51  ;;  %v327_v14 = vmul.f32 %v281_v56, %v281_v56 }
  0x32   : > { %350 = vadd.xlane.f32.xlu0 %v349_v24  ;;  %353 = vadd.xlane.f32.xlu1 %v352_v25  ;;  %v394_v7 = vsel %vm336_vm0, %v323_v4, 0.0  ;;  %v328_v18 = vmul.f32 %v282_v61, %v282_v61  ;;  %v329_v19 = vmul.f32 %v283_v5, %v283_v5  ;;  %v287_v25 = vld [vmem:[%s1968_s7 + $0xe8] sm:$0xff]  ;;  %v291_v47 = vmul.f32 %v1952_v1, %v1952_v1 }
  0x33   : > { %1581 = vmatmul.mubr.msk.f32.gmra.mxu0 %vm336_vm0, %v261_v6  ;;  %v391_v6 = vsel %vm336_vm0, %v322_v3, 0.0  ;;  %v397_v11 = vsel %vm336_vm0, %v324_v8, 0.0  ;;  %v400_v12 = vsel %vm336_vm0, %v325_v9, 0.0  ;;  %v406_v17 = vsel %vm336_vm0, %v327_v14, 0.0 }
  0x34   : > { %617 = vmatprep.mubr.f32.mxu0 %v1825_v0  ;;  %1597 = vmatmul.mubr.msk.f32.gmra.mxu1 %vm336_vm0, %v2013_v28  ;;  %v409_v21 = vsel %vm336_vm0, %v328_v18, 0.0  ;;  %v332_v28 = vmul.f32 %v286_v20, %v286_v20  ;;  %v290_v48 = vmul.f32 %v1954_v2, %v1954_v2 }
  0x35   : > { %713 = vmatprep.mubr.f32.mxu1 %v1825_v0 }
  0x36   : > { %356 = vadd.xlane.f32.xlu0 %v355_v31  ;;  %359 = vadd.xlane.f32.xlu1 %v358_v32  ;;  %v289_v31 = vld [vmem:[%s1968_s7 + $0xf8] sm:$0xff]  ;;  %v421_v32 = vsel %vm336_vm0, %v332_v28, 0.0 }
  0x37   : > { %1582 = vmatmul.mubr.msk.f32.gmra.mxu0 %vm336_vm0, %v262_v15  ;;  %v285_v15 = vld [vmem:[%s1968_s7 + $0xd8] sm:$0xff] }
  0x38   : > { %623 = vmatprep.mubr.f32.mxu0 %v1825_v0  ;;  %1598 = vmatmul.mubr.msk.f32.gmra.mxu1 %vm336_vm0, %v2033_v35  ;;  %v331_v24 = vmul.f32 %v285_v15, %v285_v15  ;;  %v335_v35 = vmul.f32 %v289_v31, %v289_v31 }
  0x39   : > { %719 = vmatprep.mubr.f32.mxu1 %v1825_v0 }
  0x3a   : > { %362 = vadd.xlane.f32.xlu0 %v361_v38  ;;  %365 = vadd.xlane.f32.xlu1 %v364_v39  ;;  %v418_v27 = vsel %vm336_vm0, %v331_v24, 0.0 }
  0x3b   : > { %1583 = vmatmul.mubr.msk.f32.gmra.mxu0 %vm336_vm0, %v263_v16  ;;  %v403_v16 = vsel %vm336_vm0, %v326_v13, 0.0 }
  0x3c   : > { %629 = vmatprep.mubr.f32.mxu0 %v1825_v0  ;;  %1599 = vmatmul.mubr.msk.f32.gmra.mxu1 %vm336_vm0, %v279_v42 }
  0x3d   : > { %725 = vmatprep.mubr.f32.mxu1 %v1825_v0 }
  0x3e   : > { %368 = vadd.xlane.f32.xlu0 %v367_v45  ;;  %371 = vadd.xlane.f32.xlu1 %v370_v46 }
  0x3f   : > { %1584 = vmatmul.mubr.msk.f32.gmra.mxu0 %vm336_vm0, %v264_v22  ;;  %v412_v22 = vsel %vm336_vm0, %v329_v19, 0.0 }
  0x40   : > { %635 = vmatprep.mubr.f32.mxu0 %v1825_v0  ;;  %1600 = vmatmul.mubr.msk.f32.gmra.mxu1 %vm336_vm0, %v280_v51  ;;  %v292_v51 = vrot.slane %v290_v48, 4 }
  0x41   : > { %731 = vmatprep.mubr.f32.mxu1 %v1825_v0 }
  0x42   : > { %374 = vadd.xlane.f32.xlu0 %v373_v52  ;;  %377 = vadd.xlane.f32.xlu1 %v376_v53  ;;  %v298_v52 = vrot.slane %v291_v47, 4  ;;  %v293_v55 = vadd.f32 %v292_v51, %v290_v48 }
  0x43   : > { %1585 = vmatmul.mubr.msk.f32.gmra.mxu0 %vm336_vm0, %v2001_v23  ;;  %v330_v23 = vmul.f32 %v284_v10, %v284_v10 }
  0x44   : > { %641 = vmatprep.mubr.f32.mxu0 %v1825_v0  ;;  %1601 = vmatmul.mubr.msk.f32.gmra.mxu1 %vm336_vm0, %v281_v56  ;;  %v299_v56 = vadd.f32 %v298_v52, %v291_v47 }
  0x45   : > { %737 = vmatprep.mubr.f32.mxu1 %v1825_v0  ;;  %v415_v26 = vsel %vm336_vm0, %v330_v23, 0.0 }
  0x46   : > { %380 = vadd.xlane.f32.xlu0 %v379_v57  ;;  %383 = vadd.xlane.f32.xlu1 %v382_v58  ;;  %v294_v58 = vrot.slane %v293_v55, 2  ;;  %v300_v59 = vrot.slane %v299_v56, 2 }
  0x47   : > { %1586 = vmatmul.mubr.msk.f32.gmra.mxu0 %vm336_vm0, %v2016_v29  ;;  %v333_v29 = vmul.f32 %v287_v25, %v287_v25 }
  0x48   : > { %647 = vmatprep.mubr.f32.mxu0 %v1825_v0  ;;  %1602 = vmatmul.mubr.msk.f32.gmra.mxu1 %vm336_vm0, %v282_v61 }
  0x49   : > { %743 = vmatprep.mubr.f32.mxu1 %v1825_v0  ;;  %v424_v33 = vsel %vm336_vm0, %v333_v29, 0.0 }
  0x4a   : > { %386 = vadd.xlane.f32.xlu0 %v385_v62  ;;  %389 = vadd.xlane.f32.xlu1 %v388_v63  ;;  %v295_v62 = vadd.f32 %v294_v58, %v293_v55  ;;  %v301_v63 = vadd.f32 %v300_v59, %v299_v56 }
  0x4b   : > { %1587 = vmatmul.mubr.msk.f32.gmra.mxu0 %vm336_vm0, %v2019_v30  ;;  %v288_v30 = vld [vmem:[%s1968_s7 + $0xf0] sm:$0xff] }
  0x4c   : > { %653 = vmatprep.mubr.f32.mxu0 %v1825_v0  ;;  %1603 = vmatmul.mubr.msk.f32.gmra.mxu1 %vm336_vm0, %v283_v5  ;;  %v334_v34 = vmul.f32 %v288_v30, %v288_v30  ;;  %v296_v1 = vrot.slane %v295_v62, 1  ;;  %v302_v4 = vrot.slane %v301_v63, 1 }
  0x4d   : > { %749 = vmatprep.mubr.f32.mxu1 %v1825_v0 }
  0x4e   : > { %392 = vadd.xlane.f32.xlu0 %v391_v6  ;;  %395 = vadd.xlane.f32.xlu1 %v394_v7  ;;  %v2170_v2 = vadd.f32 %v296_v1, %v295_v62  ;;  %v2172_v6 = vadd.f32 %v302_v4, %v301_v63 }
  0x4f   : > { %1588 = vmatmul.mubr.msk.f32.gmra.mxu0 %vm336_vm0, %v2036_v36  ;;  %v427_v36 = vsel %vm336_vm0, %v334_v34, 0.0 }
  0x50   : > { %659 = vmatprep.mubr.f32.mxu0 %v1825_v0  ;;  %1604 = vmatmul.mubr.msk.f32.gmra.mxu1 %vm336_vm0, %v284_v10 }
  0x51   : > { %755 = vmatprep.mubr.f32.mxu1 %v1825_v0 }
  0x52   : > { %398 = vadd.xlane.f32.xlu0 %v397_v11  ;;  %401 = vadd.xlane.f32.xlu1 %v400_v12 }
  0x53   : > { %1589 = vmatmul.mubr.msk.f32.gmra.mxu0 %vm336_vm0, %v2039_v37  ;;  %v430_v37 = vsel %vm336_vm0, %v335_v35, 0.0 }
  0x54   : > { %665 = vmatprep.mubr.f32.mxu0 %v1825_v0  ;;  %1605 = vmatmul.mubr.msk.f32.gmra.mxu1 %vm336_vm0, %v285_v15 }
  0x55   : > { %761 = vmatprep.mubr.f32.mxu1 %v1825_v0 }
  0x56   : > { %404 = vadd.xlane.f32.xlu0 %v403_v16  ;;  %407 = vadd.xlane.f32.xlu1 %v406_v17 }
  0x57   : > { %1590 = vmatmul.mubr.msk.f32.gmra.mxu0 %vm336_vm0, %v2054_v43 }
  0x58   : > { %671 = vmatprep.mubr.f32.mxu0 %v1825_v0  ;;  %1606 = vmatmul.mubr.msk.f32.gmra.mxu1 %vm336_vm0, %v286_v20 }
  0x59   : > { %767 = vmatprep.mubr.f32.mxu1 %v1825_v0 }
  0x5a   : > { %410 = vadd.xlane.f32.xlu0 %v409_v21  ;;  %413 = vadd.xlane.f32.xlu1 %v412_v22 }
  0x5b   : > { %1591 = vmatmul.mubr.msk.f32.gmra.mxu0 %vm336_vm0, %v2057_v44 }
  0x5c   : > { %677 = vmatprep.mubr.f32.mxu0 %v1825_v0  ;;  %1607 = vmatmul.mubr.msk.f32.gmra.mxu1 %vm336_vm0, %v287_v25 }
  0x5d   : > { %773 = vmatprep.mubr.f32.mxu1 %v1825_v0 }
  0x5e   : > { %416 = vadd.xlane.f32.xlu0 %v415_v26  ;;  %419 = vadd.xlane.f32.xlu1 %v418_v27 }
  0x5f   : > { %1592 = vmatmul.mubr.msk.f32.gmra.mxu0 %vm336_vm0, %v2069_v49 }
  0x60   : > { %683 = vmatprep.mubr.f32.mxu0 %v1825_v0  ;;  %1608 = vmatmul.mubr.msk.f32.gmra.mxu1 %vm336_vm0, %v288_v30 }
  0x61   : > { %779 = vmatprep.mubr.f32.mxu1 %v1825_v0 }
  0x62   : > { %422 = vadd.xlane.f32.xlu0 %v421_v32  ;;  %425 = vadd.xlane.f32.xlu1 %v424_v33 }
  0x63   : > { %1593 = vmatmul.mubr.msk.f32.gmra.mxu0 %vm336_vm0, %v2072_v50 }
  0x64   : > { %1609 = vmatmul.mubr.msk.f32.gmra.mxu1 %vm336_vm0, %v289_v31 }
  0x66   : > { %428 = vadd.xlane.f32.xlu0 %v427_v36  ;;  %431 = vadd.xlane.f32.xlu1 %v430_v37 }
  0xb3   : > { %v339_v38 = vpop.xlane.xlu0 %338  ;;  %v345_v39 = vpop.xlane.xlu1 %344 }
  0xb4   : > { %v2175_v9 = vadd.f32 %v339_v38, %v2170_v2  ;;  %v2178_v10 = vadd.f32 %v339_v38, %v2172_v6  ;;  %v2181_v11 = vadd.f32 %v345_v39, %v2170_v2  ;;  %v2184_v12 = vadd.f32 %v345_v39, %v2172_v6 }
  0xb7   : > { %v342_v40 = vpop.xlane.xlu0 %341  ;;  %v348_v41 = vpop.xlane.xlu1 %347 }
  0xb8   : > { %v2187_v13 = vadd.f32 %v342_v40, %v2170_v2  ;;  %v2190_v14 = vadd.f32 %v342_v40, %v2172_v6  ;;  %v2193_v15 = vadd.f32 %v348_v41, %v2170_v2  ;;  %v2196_v16 = vadd.f32 %v348_v41, %v2172_v6 }
  0xbb   : > { %v351_v42 = vpop.xlane.xlu0 %350  ;;  %v354_v43 = vpop.xlane.xlu1 %353 }
  0xbc   : > { %v2199_v18 = vadd.f32 %v351_v42, %v2170_v2  ;;  %v2202_v19 = vadd.f32 %v351_v42, %v2172_v6  ;;  %v2205_v20 = vadd.f32 %v354_v43, %v2170_v2  ;;  %v2208_v21 = vadd.f32 %v354_v43, %v2172_v6 }
  0xbf   : > { %v357_v0 = vpop.xlane.xlu0 %356  ;;  %v360_v44 = vpop.xlane.xlu1 %359 }
  0xc0   : > { %v2211_v22 = vadd.f32 %v357_v0, %v2170_v2  ;;  %v2214_v23 = vadd.f32 %v357_v0, %v2172_v6  ;;  %v2217_v24 = vadd.f32 %v360_v44, %v2170_v2  ;;  %v2220_v25 = vadd.f32 %v360_v44, %v2172_v6 }
  0xc3   : > { %v363_v45 = vpop.xlane.xlu0 %362  ;;  %v366_v46 = vpop.xlane.xlu1 %365 }
  0xc4   : > { %v2223_v27 = vadd.f32 %v363_v45, %v2170_v2  ;;  %v2226_v28 = vadd.f32 %v363_v45, %v2172_v6  ;;  %v2229_v29 = vadd.f32 %v366_v46, %v2170_v2  ;;  %v2232_v30 = vadd.f32 %v366_v46, %v2172_v6 }
  0xc7   : > { %v369_v49 = vpop.xlane.xlu0 %368  ;;  %v372_v50 = vpop.xlane.xlu1 %371 }
  0xc8   : > { %v2235_v32 = vadd.f32 %v369_v49, %v2170_v2  ;;  %v2238_v33 = vadd.f32 %v369_v49, %v2172_v6  ;;  %v2241_v34 = vadd.f32 %v372_v50, %v2170_v2  ;;  %v2244_v35 = vadd.f32 %v372_v50, %v2172_v6 }
  0xca   : > { %3102 = vst [vmem:[#allocation10_spill] sm:$0xff] %v2235_v32  ;;  %3103 = vst [vmem:[#allocation11_spill] sm:$0xff] %v2238_v33 }
  0xcb   : > { %v375_v53 = vpop.xlane.xlu0 %374  ;;  %v378_v54 = vpop.xlane.xlu1 %377  ;;  %3104 = vst [vmem:[#allocation12_spill] sm:$0xff] %v2241_v34  ;;  %3105 = vst [vmem:[#allocation13_spill] sm:$0xff] %v2244_v35 }
  0xcc   : > { %v2247_v37 = vadd.f32 %v375_v53, %v2170_v2  ;;  %v2250_v38 = vadd.f32 %v375_v53, %v2172_v6  ;;  %v2253_v39 = vadd.f32 %v378_v54, %v2170_v2  ;;  %v2256_v40 = vadd.f32 %v378_v54, %v2172_v6 }
  0xce   : > { %3106 = vst [vmem:[#allocation14_spill] sm:$0xff] %v2247_v37  ;;  %3107 = vst [vmem:[#allocation15_spill] sm:$0xff] %v2250_v38 }
  0xcf   : > { %v381_v57 = vpop.xlane.xlu0 %380  ;;  %v384_v60 = vpop.xlane.xlu1 %383  ;;  %3108 = vst [vmem:[#allocation16_spill] sm:$0xff] %v2253_v39  ;;  %3109 = vst [vmem:[#allocation17_spill] sm:$0xff] %v2256_v40 }
  0xd0   : > { %v2259_v43 = vadd.f32 %v381_v57, %v2170_v2  ;;  %v2262_v0 = vadd.f32 %v381_v57, %v2172_v6  ;;  %v2265_v44 = vadd.f32 %v384_v60, %v2170_v2  ;;  %v2268_v45 = vadd.f32 %v384_v60, %v2172_v6 }
  0xd2   : > { %3110 = vst [vmem:[#allocation18_spill] sm:$0xff] %v2259_v43  ;;  %3111 = vst [vmem:[#allocation19_spill] sm:$0xff] %v2262_v0 }
  0xd3   : > { %v387_v61 = vpop.xlane.xlu0 %386  ;;  %v390_v3 = vpop.xlane.xlu1 %389  ;;  %3112 = vst [vmem:[#allocation20_spill] sm:$0xff] %v2265_v44  ;;  %3113 = vst [vmem:[#allocation21_spill] sm:$0xff] %v2268_v45 }
  0xd4   : > { %v818_v47 = vadd.f32 %v387_v61, %v2170_v2  ;;  %v2272_v48 = vadd.f32 %v387_v61, %v2172_v6  ;;  %v820_v50 = vadd.f32 %v390_v3, %v2170_v2  ;;  %v2276_v51 = vadd.f32 %v390_v3, %v2172_v6 }
  0xd7   : > { %v393_v5 = vpop.xlane.xlu0 %392  ;;  %v396_v7 = vpop.xlane.xlu1 %395 }
  0xd8   : > { %v2279_v54 = vadd.f32 %v393_v5, %v2170_v2  ;;  %v2282_v55 = vadd.f32 %v393_v5, %v2172_v6  ;;  %v2285_v56 = vadd.f32 %v396_v7, %v2170_v2  ;;  %v2288_v60 = vadd.f32 %v396_v7, %v2172_v6 }
  0xdb   : > { %v399_v8 = vpop.xlane.xlu0 %398  ;;  %v402_v17 = vpop.xlane.xlu1 %401 }
  0xdc   : > { %v2291_v61 = vadd.f32 %v399_v8, %v2170_v2  ;;  %v2294_v62 = vadd.f32 %v399_v8, %v2172_v6  ;;  %v2297_v1 = vadd.f32 %v402_v17, %v2170_v2  ;;  %v2300_v4 = vadd.f32 %v402_v17, %v2172_v6 }
  0xdf   : > { %v405_v26 = vpop.xlane.xlu0 %404  ;;  %v408_v36 = vpop.xlane.xlu1 %407 }
  0xe0   : > { %v2303_v5 = vadd.f32 %v405_v26, %v2170_v2  ;;  %v2306_v45 = vadd.f32 %v405_v26, %v2172_v6  ;;  %v2309_v8 = vadd.f32 %v408_v36, %v2170_v2 }
  0xe3   : > { %v411_v46 = vpop.xlane.xlu0 %410  ;;  %v414_v57 = vpop.xlane.xlu1 %413 }
  0xe4   : > { %v2316_v40 = vadd.f32 %v411_v46, %v2170_v2  ;;  %v2319_v26 = vadd.f32 %v411_v46, %v2172_v6  ;;  %v2322_v35 = vadd.f32 %v414_v57, %v2170_v2 }
  0xe7   : > { %v595_v31 = vpop.f32.mrf.mxu0  ;;  %v420_v39 = vpop.xlane.xlu1 %419 }
  0xe8   : > { %v691_v41 = vpop.f32.mrf.mxu1  ;;  %v850_v52 = vmul.f32 2.0, %v595_v31  ;;  %v417_v31 = vpop.xlane.xlu0 %416  ;;  %v2335_v33 = vadd.f32 %v420_v39, %v2170_v2 }
  0xe9   : > { %v597_v42 = vpop.f32.mrf.mxu0  ;;  %v882_v58 = vmul.f32 2.0, %v691_v41 }
  0xea   : > { %v693_v49 = vpop.f32.mrf.mxu1  ;;  %v851_v7 = vmul.f32 2.0, %v597_v42  ;;  %v914_v44 = vsub.f32 %v2175_v9, %v850_v52  ;;  %3117 = vst [vmem:[#allocation25_spill] sm:$0xff] %v2335_v33 }
  0xeb   : > { %v601_v53 = vpop.f32.mrf.mxu0  ;;  %v883_v43 = vmul.f32 2.0, %v693_v49  ;;  %v946_v42 = vsub.f32 %v818_v47, %v882_v58  ;;  %v2328_v49 = vadd.f32 %v417_v31, %v2170_v2 }
  0xec   : > { %v697_v59 = vpop.f32.mrf.mxu1  ;;  %v852_v0 = vmul.f32 2.0, %v601_v53  ;;  %v2331_v53 = vadd.f32 %v417_v31, %v2172_v6  ;;  %v423_v47 = vpop.xlane.xlu0 %422  ;;  %v915_v58 = vsub.f32 %v2178_v10, %v851_v7  ;;  %v2340_v32 = vmax.f32 %v914_v44, 0.0 }
  0xed   : > { %v603_v63 = vpop.f32.mrf.mxu0  ;;  %v884_v3 = vmul.f32 2.0, %v697_v59  ;;  %v2312_v59 = vadd.f32 %v408_v36, %v2172_v6  ;;  %v2325_v36 = vadd.f32 %v414_v57, %v2172_v6  ;;  %3115 = vst [vmem:[#allocation23_spill] sm:$0xff] %v2328_v49  ;;  %v2338_v57 = vadd.f32 %v420_v39, %v2172_v6 }
  0xee   : > { %v699_v41 = vpop.f32.mrf.mxu1  ;;  %3116 = vst [vmem:[#allocation24_spill] sm:$0xff] %v2331_v53  ;;  %v947_v31 = vsub.f32 %v2272_v48, %v883_v43  ;;  %v426_v53 = vpop.xlane.xlu1 %425  ;;  %v2344_v10 = vmax.f32 %v946_v42, 0.0  ;;  %v2347_v7 = vadd.f32 %v423_v47, %v2170_v2  ;;  %v2355_v43 = vmax.f32 %v915_v58, 0.0 }
  0xef   : > { %v607_v17 = vpop.f32.mrf.mxu0  ;;  %3114 = vst [vmem:[#allocation22_spill] sm:$0xff] %v2325_v36  ;;  %v948_v9 = vsub.f32 %v820_v50, %v884_v3  ;;  %v885_v52 = vmul.f32 2.0, %v699_v41  ;;  %3118 = vst [vmem:[#allocation26_spill] sm:$0xff] %v2338_v57  ;;  %v916_v50 = vsub.f32 %v2187_v13, %v852_v0  ;;  %v853_v3 = vmul.f32 2.0, %v603_v63 }
  0xf0   : > { %v703_v38 = vpop.f32.mrf.mxu1  ;;  %v854_v49 = vmul.f32 2.0, %v607_v17  ;;  %3119 = vst [vmem:[#allocation27_spill] sm:$0xff] %v2344_v10  ;;  %3120 = vst [vmem:[#allocation28_spill] sm:$0xff] %v2347_v7  ;;  %v2353_v13 = vadd.f32 %v423_v47, %v2172_v6  ;;  %v429_v0 = vpop.xlane.xlu0 %428  ;;  %v2359_v17 = vadd.f32 %v426_v53, %v2170_v2 }
  0xf1   : > { %v609_v37 = vpop.f32.mrf.mxu0  ;;  %v886_v46 = vmul.f32 2.0, %v703_v38  ;;  %v2349_v39 = vmax.f32 %v948_v9, 0.0  ;;  %v949_v44 = vsub.f32 %v2276_v51, %v885_v52  ;;  %v2361_v42 = vmax.f32 %v916_v50, 0.0 }
  0xf2   : > { %v705_v34 = vpop.f32.mrf.mxu1  ;;  %v855_v36 = vmul.f32 2.0, %v609_v37  ;;  %3122 = vst [vmem:[#allocation30_spill] sm:$0xff] %v2359_v17  ;;  %v917_v9 = vsub.f32 %v2190_v14, %v853_v3  ;;  %v2364_v51 = vmax.f32 %v947_v31, 0.0  ;;  %v918_v52 = vsub.f32 %v2181_v11, %v854_v49 }
  0xf3   : > { %v613_v41 = vpop.f32.mrf.mxu0  ;;  %3121 = vst [vmem:[#allocation29_spill] sm:$0xff] %v2349_v39  ;;  %v887_v57 = vmul.f32 2.0, %v705_v34  ;;  %v950_v37 = vsub.f32 %v2279_v54, %v886_v46  ;;  %v2367_v34 = vadd.f32 %v426_v53, %v2172_v6  ;;  %v2372_v46 = vadd.f32 %v429_v0, %v2170_v2 }
  0xf4   : > { %v709_v38 = vpop.f32.mrf.mxu1  ;;  %3123 = vst [vmem:[#allocation31_spill] sm:$0xff] %v2364_v51  ;;  %v919_v47 = vsub.f32 %v2184_v12, %v855_v36  ;;  %v856_v54 = vmul.f32 2.0, %v613_v41  ;;  %v1056_v14 = vmin.f32 %v2349_v39, %v2344_v10  ;;  %v2376_v3 = vmax.f32 %v949_v44, 0.0 }
  0xf5   : > { %v615_v33 = vpop.f32.mrf.mxu0  ;;  %v888_v48 = vmul.f32 2.0, %v709_v38  ;;  %3124 = vst [vmem:[#allocation32_spill] sm:$0xff] %v2367_v34  ;;  %3125 = vst [vmem:[#allocation33_spill] sm:$0xff] %v2372_v46  ;;  %v432_v38 = vpop.xlane.xlu1 %431  ;;  %v951_v53 = vsub.f32 %v2282_v55, %v887_v57  ;;  %v2379_v34 = vmax.f32 %v950_v37, 0.0  ;;  %v2382_v49 = vmax.f32 %v917_v9, 0.0 }
  0xf6   : > { %v711_v63 = vpop.f32.mrf.mxu1  ;;  %v857_v50 = vmul.f32 2.0, %v615_v33  ;;  %3126 = vst [vmem:[#allocation34_spill] sm:$0xff] %v2376_v3  ;;  %v2385_v33 = vadd.f32 %v429_v0, %v2172_v6  ;;  %v2388_v10 = vadd.f32 %v432_v38, %v2170_v2  ;;  %v2390_v44 = vmax.f32 %v918_v52, 0.0 }
  0xf7   : > { %v619_v7 = vpop.f32.mrf.mxu0  ;;  %3127 = vst [vmem:[#allocation35_spill] sm:$0xff] %v2379_v34  ;;  %v952_v11 = vsub.f32 %v2285_v56, %v888_v48  ;;  %v889_v12 = vmul.f32 2.0, %v711_v63  ;;  %v2392_v55 = vmax.f32 %v919_v47, 0.0  ;;  %v920_v57 = vsub.f32 %v2193_v15, %v856_v54 }
  0xf8   : > { %v715_v58 = vpop.f32.mrf.mxu1  ;;  %v858_v31 = vmul.f32 2.0, %v619_v7  ;;  %v921_v37 = vsub.f32 %v2196_v16, %v857_v50  ;;  %v1093_v48 = vmin.f32 %v2376_v3, %v2364_v51  ;;  %v2398_v9 = vmax.f32 %v951_v53, 0.0 }
  0xf9   : > { %v621_v17 = vpop.f32.mrf.mxu0  ;;  %v890_v46 = vmul.f32 2.0, %v715_v58  ;;  %v1058_v52 = vmin.f32 %v1056_v14, %v2379_v34  ;;  %v2402_v58 = vmax.f32 %v952_v11, 0.0  ;;  %v953_v47 = vsub.f32 %v2288_v60, %v889_v12 }
  0xfa   : > { %v717_v36 = vpop.f32.mrf.mxu1  ;;  %v859_v7 = vmul.f32 2.0, %v621_v17  ;;  %3128 = vst [vmem:[#allocation36_spill] sm:$0xff] %v2398_v9  ;;  %v922_v2 = vsub.f32 %v2199_v18, %v858_v31  ;;  %v2407_v51 = vadd.f32 %v432_v38, %v2172_v6  ;;  %v1042_v53 = vmin.f32 %v2340_v32, %v2390_v44 }
  0xfb   : > { %v625_v41 = vpop.f32.mrf.mxu0  ;;  %v891_v0 = vmul.f32 2.0, %v717_v36  ;;  %3129 = vst [vmem:[#allocation37_spill] sm:$0xff] %v2402_v58  ;;  %v954_v16 = vsub.f32 %v2291_v61, %v890_v46  ;;  %v1079_v18 = vmin.f32 %v2355_v43, %v2392_v55  ;;  %v2413_v14 = vmax.f32 %v920_v57, 0.0 }
  0xfc   : > { %v721_v56 = vpop.f32.mrf.mxu1  ;;  %v860_v17 = vmul.f32 2.0, %v625_v41  ;;  %v923_v31 = vsub.f32 %v2202_v19, %v859_v7  ;;  %v2416_v11 = vmax.f32 %v921_v37, 0.0  ;;  %v1095_v61 = vmin.f32 %v1093_v48, %v2398_v9 }
  0xfd   : > { %v627_v63 = vpop.f32.mrf.mxu0  ;;  %v892_v50 = vmul.f32 2.0, %v721_v56  ;;  %v955_v6 = vsub.f32 %v2294_v62, %v891_v0  ;;  %v2420_v38 = vmax.f32 %v922_v2, 0.0  ;;  %v1060_v36 = vmin.f32 %v1058_v52, %v2402_v58 }
  0xfe   : > { %v723_v15 = vpop.f32.mrf.mxu1  ;;  %v861_v12 = vmul.f32 2.0, %v627_v63  ;;  %v2423_v41 = vmax.f32 %v953_v47, 0.0  ;;  %v924_v34 = vsub.f32 %v2205_v20, %v860_v17  ;;  %v2426_v37 = vmax.f32 %v954_v16, 0.0 }
  0xff   : > { %v631_v54 = vpop.f32.mrf.mxu0  ;;  %v893_v56 = vmul.f32 2.0, %v723_v15  ;;  %v956_v63 = vsub.f32 %v2297_v1, %v892_v50  ;;  %v1043_v48 = vmin.f32 %v2361_v42, %v2413_v14  ;;  %v2431_v62 = vmax.f32 %v923_v31, 0.0 }
 0x100   : > { %v727_v60 = vpop.f32.mrf.mxu1  ;;  %3130 = vst [vmem:[#allocation38_spill] sm:$0xff] %v2423_v41  ;;  %v862_v19 = vmul.f32 2.0, %v631_v54  ;;  %3131 = vst [vmem:[#allocation39_spill] sm:$0xff] %v2426_v37  ;;  %v1080_v47 = vmin.f32 %v2382_v49, %v2416_v11  ;;  %v925_v15 = vsub.f32 %v2208_v21, %v861_v12  ;;  %v2436_v17 = vmax.f32 %v955_v6, 0.0 }
 0x101   : > { %v633_v46 = vpop.f32.mrf.mxu0  ;;  %v894_v2 = vmul.f32 2.0, %v727_v60  ;;  %v2439_v16 = vmin.f32 %v1042_v53, %v2420_v38  ;;  %v1097_v50 = vmin.f32 %v1095_v61, %v2423_v41  ;;  %v957_v31 = vsub.f32 %v2300_v4, %v893_v56 }
 0x102   : > { %v729_v57 = vpop.f32.mrf.mxu1  ;;  %v863_v0 = vmul.f32 2.0, %v633_v46  ;;  %3132 = vst [vmem:[#allocation40_spill] sm:$0xff] %v2436_v17  ;;  %v2443_v60 = vmax.f32 %v924_v34, 0.0  ;;  %v926_v9 = vsub.f32 %v2211_v22, %v862_v19  ;;  %v1057_v58 = vmin.f32 %v2426_v37, %v1060_v36 }
 0x103   : > { %v637_v7 = vpop.f32.mrf.mxu0  ;;  %v895_v54 = vmul.f32 2.0, %v729_v57  ;;  %v2447_v12 = vmax.f32 %v956_v63, 0.0  ;;  %v2450_v6 = vmin.f32 %v1079_v18, %v2431_v62  ;;  %v958_v57 = vsub.f32 %v2303_v5, %v894_v2 }
 0x104   : > { %v733_v52 = vpop.f32.mrf.mxu1  ;;  %v864_v1 = vmul.f32 2.0, %v637_v7  ;;  %v927_v53 = vsub.f32 %v2214_v23, %v863_v0  ;;  %v2454_v4 = vmax.f32 %v925_v15, 0.0  ;;  %v1094_v56 = vmin.f32 %v2436_v17, %v1097_v50 }
 0x105   : > { %v639_v20 = vpop.f32.mrf.mxu0  ;;  %3133 = vst [vmem:[#allocation41_spill] sm:$0xff] %v2447_v12  ;;  %v896_v61 = vmul.f32 2.0, %v733_v52  ;;  %v959_v36 = vsub.f32 %v2306_v45, %v895_v54  ;;  %v2459_v37 = vmax.f32 %v957_v31, 0.0  ;;  %v2462_v23 = vmin.f32 %v1043_v48, %v2443_v60 }
 0x106   : > { %v735_v46 = vpop.f32.mrf.mxu1  ;;  %v865_v34 = vmul.f32 2.0, %v639_v20  ;;  %v928_v19 = vsub.f32 %v2217_v24, %v864_v1  ;;  %v2464_v5 = vmax.f32 %v926_v9, 0.0  ;;  %v1059_v0 = vmin.f32 %v1057_v58, %v2447_v12 }
 0x107   : > { %v643_v21 = vpop.f32.mrf.mxu0  ;;  %3134 = vst [vmem:[#allocation42_spill] sm:$0xff] %v2459_v37  ;;  %v897_v18 = vmul.f32 2.0, %v735_v46  ;;  %v2467_v15 = vmax.f32 %v927_v53, 0.0  ;;  %v2469_v45 = vmax.f32 %v958_v57, 0.0  ;;  %v960_v24 = vsub.f32 %v2309_v8, %v896_v61 }
 0x108   : > { %v739_v7 = vpop.f32.mrf.mxu1  ;;  %v866_v63 = vmul.f32 2.0, %v643_v21  ;;  %v2473_v1 = vmin.f32 %v1080_v47, %v2454_v4  ;;  %v929_v48 = vsub.f32 %v2220_v25, %v865_v34  ;;  %v2476_v9 = vmax.f32 %v959_v36, 0.0 }
 0x109   : > { %v645_v22 = vpop.f32.mrf.mxu0  ;;  %v898_v52 = vmul.f32 2.0, %v739_v7  ;;  %3135 = vst [vmem:[#allocation43_spill] sm:$0xff] %v2469_v45  ;;  %v2478_v58 = vmax.f32 %v928_v19, 0.0  ;;  %v1096_v21 = vmin.f32 %v1094_v56, %v2459_v37  ;;  %v961_v53 = vsub.f32 %v2312_v59, %v897_v18 }
 0x10a   : > { %v741_v41 = vpop.f32.mrf.mxu1  ;;  %v867_v20 = vmul.f32 2.0, %v645_v22  ;;  %3136 = vst [vmem:[#allocation44_spill] sm:$0xff] %v2476_v9  ;;  %v930_v46 = vsub.f32 %v2223_v27, %v866_v63  ;;  %v1046_v8 = vmin.f32 %v2439_v16, %v2464_v5  ;;  %v1061_v27 = vmin.f32 %v1059_v0, %v2469_v45  ;;  %v3145_v45 = vld [vmem:[#allocation23_spill] sm:$0xff] }
 0x10b   : > { %v649_v2 = vpop.f32.mrf.mxu0  ;;  %v899_v31 = vmul.f32 2.0, %v741_v41  ;;  %v962_v25 = vsub.f32 %v2316_v40, %v898_v52  ;;  %v1083_v41 = vmin.f32 %v2450_v6, %v2467_v15  ;;  %v2490_v22 = vmax.f32 %v960_v24, 0.0 }
 0x10c   : > { %v745_v54 = vpop.f32.mrf.mxu1  ;;  %v868_v47 = vmul.f32 2.0, %v649_v2  ;;  %v931_v34 = vsub.f32 %v2226_v28, %v867_v20  ;;  %v2492_v59 = vmax.f32 %v929_v48, 0.0  ;;  %v1098_v16 = vmin.f32 %v1096_v21, %v2476_v9 }
 0x10d   : > { %v651_v50 = vpop.f32.mrf.mxu0  ;;  %v900_v7 = vmul.f32 2.0, %v745_v54  ;;  %3137 = vst [vmem:[#allocation45_spill] sm:$0xff] %v2490_v22  ;;  %v963_v63 = vsub.f32 %v2319_v26, %v899_v31  ;;  %v1047_v40 = vmin.f32 %v2462_v23, %v2478_v58  ;;  %v2498_v18 = vmax.f32 %v930_v46, 0.0 }
 0x10e   : > { %v747_v57 = vpop.f32.mrf.mxu1  ;;  %v869_v36 = vmul.f32 2.0, %v651_v50  ;;  %v2500_v6 = vmax.f32 %v961_v53, 0.0  ;;  %v932_v2 = vsub.f32 %v2229_v29, %v868_v47  ;;  %v2503_v24 = vmax.f32 %v962_v25, 0.0  ;;  %v3141_v25 = vld [vmem:[#allocation22_spill] sm:$0xff] }
 0x10f   : > { %v655_v61 = vpop.f32.mrf.mxu0  ;;  %v901_v28 = vmul.f32 2.0, %v747_v57  ;;  %v964_v54 = vsub.f32 %v2322_v35, %v900_v7  ;;  %v2506_v48 = vmax.f32 %v931_v34, 0.0  ;;  %v1062_v50 = vmin.f32 %v2490_v22, %v1061_v27 }
 0x110   : > { %v751_v56 = vpop.f32.mrf.mxu1  ;;  %3138 = vst [vmem:[#allocation46_spill] sm:$0xff] %v2500_v6  ;;  %v870_v52 = vmul.f32 2.0, %v655_v61  ;;  %3139 = vst [vmem:[#allocation47_spill] sm:$0xff] %v2503_v24  ;;  %v1084_v46 = vmin.f32 %v2473_v1, %v2492_v59  ;;  %v933_v21 = vsub.f32 %v2232_v30, %v869_v36  ;;  %v2512_v29 = vmax.f32 %v963_v63, 0.0 }
 0x111   : > { %v657_v19 = vpop.f32.mrf.mxu0  ;;  %v902_v23 = vmul.f32 2.0, %v751_v56  ;;  %v2515_v47 = vmin.f32 %v1046_v8, %v2498_v18  ;;  %v1099_v61 = vmin.f32 %v2500_v6, %v1098_v16  ;;  %v965_v7 = vsub.f32 %v3141_v25, %v901_v28  ;;  %v3142_v56 = vld [vmem:[#allocation10_spill] sm:$0xff]  ;;  %v3144_v8 = vld [vmem:[#allocation11_spill] sm:$0xff] }
 0x112   : > { %v753_v0 = vpop.f32.mrf.mxu1  ;;  %v871_v26 = vmul.f32 2.0, %v657_v19  ;;  %3140 = vst [vmem:[#allocation48_spill] sm:$0xff] %v2512_v29  ;;  %v2519_v27 = vmax.f32 %v932_v2, 0.0  ;;  %v934_v19 = vsub.f32 %v3142_v56, %v870_v52  ;;  %v1064_v1 = vmin.f32 %v1062_v50, %v2503_v24  ;;  %v3146_v56 = vld [vmem:[#allocation24_spill] sm:$0xff] }
 0x113   : > { %v661_v20 = vpop.f32.mrf.mxu0  ;;  %v903_v57 = vmul.f32 2.0, %v753_v0  ;;  %v2523_v36 = vmax.f32 %v964_v54, 0.0  ;;  %v2526_v63 = vmin.f32 %v1083_v41, %v2506_v48  ;;  %v966_v16 = vsub.f32 %v3145_v45, %v902_v23  ;;  %v3147_v24 = vld [vmem:[#allocation12_spill] sm:$0xff] }
 0x114   : > { %v757_v31 = vpop.f32.mrf.mxu1  ;;  %v872_v35 = vmul.f32 2.0, %v661_v20  ;;  %v935_v0 = vsub.f32 %v3144_v8, %v871_v26  ;;  %v2530_v28 = vmax.f32 %v933_v21, 0.0  ;;  %v1101_v25 = vmin.f32 %v1099_v61, %v2512_v29  ;;  %v3149_v61 = vld [vmem:[#allocation14_spill] sm:$0xff] }
 0x115   : > { %v663_v53 = vpop.f32.mrf.mxu0  ;;  %3143 = vst [vmem:[#allocation22_spill] sm:$0xff] %v2523_v36  ;;  %v967_v50 = vsub.f32 %v3146_v56, %v903_v57  ;;  %v2535_v6 = vmax.f32 %v965_v7, 0.0  ;;  %v904_v41 = vmul.f32 2.0, %v757_v31  ;;  %v1049_v26 = vmin.f32 %v1047_v40, %v2519_v27  ;;  %v3151_v31 = vld [vmem:[#allocation13_spill] sm:$0xff] }
 0x116   : > { %v759_v34 = vpop.f32.mrf.mxu1  ;;  %v873_v2 = vmul.f32 2.0, %v663_v53  ;;  %v936_v54 = vsub.f32 %v3147_v24, %v872_v35  ;;  %v1066_v45 = vmin.f32 %v1064_v1, %v2523_v36  ;;  %v2541_v53 = vmax.f32 %v935_v0, 0.0  ;;  %v3154_v36 = vld [vmem:[#allocation25_spill] sm:$0xff] }
 0x117   : > { %v667_v30 = vpop.f32.mrf.mxu0  ;;  %3148 = vst [vmem:[#allocation10_spill] sm:$0xff] %v2535_v6  ;;  %v905_v21 = vmul.f32 2.0, %v759_v34  ;;  %v2544_v56 = vmax.f32 %v966_v16, 0.0  ;;  %v1086_v35 = vmin.f32 %v1084_v46, %v2530_v28  ;;  %v2549_v29 = vmax.f32 %v967_v50, 0.0 }
 0x118   : > { %v874_v20 = vmul.f32 2.0, %v667_v30  ;;  %v763_v9 = vpop.f32.mrf.mxu1  ;;  %v2538_v30 = vmax.f32 %v934_v19, 0.0  ;;  %v937_v7 = vsub.f32 %v3151_v31, %v873_v2  ;;  %v2551_v1 = vmax.f32 %v936_v54, 0.0  ;;  %v3156_v2 = vld [vmem:[#allocation26_spill] sm:$0xff] }
 0x119   : > { %v669_v52 = vpop.f32.mrf.mxu0  ;;  %3150 = vst [vmem:[#allocation11_spill] sm:$0xff] %v2544_v56  ;;  %3153 = vst [vmem:[#allocation23_spill] sm:$0xff] %v2549_v29  ;;  %v1103_v34 = vmin.f32 %v1101_v25, %v2535_v6  ;;  %v969_v31 = vsub.f32 %v3156_v2, %v905_v21  ;;  %v1087_v50 = vmin.f32 %v2526_v63, %v2541_v53  ;;  %v3160_v21 = vld [vmem:[#allocation18_spill] sm:$0xff] }
 0x11a   : > { %v875_v22 = vmul.f32 2.0, %v669_v52  ;;  %v765_v17 = vpop.f32.mrf.mxu1  ;;  %v938_v8 = vsub.f32 %v3149_v61, %v874_v20  ;;  %v3152_v52 = vld [vmem:[#allocation15_spill] sm:$0xff]  ;;  %v968_v20 = vsub.f32 %v3154_v36, %v904_v41  ;;  %v1050_v16 = vmin.f32 %v2515_v47, %v2538_v30  ;;  %v3155_v61 = vld [vmem:[#allocation16_spill] sm:$0xff]  ;;  %v3159_v47 = vld [vmem:[#allocation17_spill] sm:$0xff] }
 0x11b   : > { %v673_v23 = vpop.f32.mrf.mxu0  ;;  %v1068_v25 = vmin.f32 %v1066_v45, %v2544_v56  ;;  %v2564_v36 = vmax.f32 %v937_v7, 0.0  ;;  %v2576_v7 = vmax.f32 %v969_v31, 0.0  ;;  %v907_v39 = vmul.f32 2.0, %v765_v17  ;;  %v3164_v17 = vld [vmem:[#allocation20_spill] sm:$0xff] }
 0x11c   : > { %v876_v57 = vmul.f32 2.0, %v673_v23  ;;  %v769_v24 = vpop.f32.mrf.mxu1  ;;  %v939_v40 = vsub.f32 %v3152_v52, %v875_v22  ;;  %v906_v22 = vmul.f32 2.0, %v763_v9  ;;  %v2561_v54 = vmax.f32 %v938_v8, 0.0 }
 0x11d   : > { %v675_v19 = vpop.f32.mrf.mxu0  ;;  %v1051_v9 = vmin.f32 %v1049_v26, %v2551_v1  ;;  %v2572_v8 = vmax.f32 %v968_v20, 0.0 }
 0x11e   : > { %v877_v0 = vmul.f32 2.0, %v675_v19  ;;  %v771_v23 = vpop.f32.mrf.mxu1  ;;  %v940_v46 = vsub.f32 %v3155_v61, %v876_v57  ;;  %3157 = vst [vmem:[#allocation24_spill] sm:$0xff] %v2561_v54  ;;  %v2566_v41 = vmax.f32 %v939_v40, 0.0  ;;  %v1105_v57 = vmin.f32 %v1103_v34, %v2549_v29  ;;  %v3161_v40 = vld [vmem:[#allocation28_spill] sm:$0xff] }
 0x11f   : > { %v679_v12 = vpop.f32.mrf.mxu0  ;;  %v970_v56 = vsub.f32 %v3161_v40, %v906_v22 }
 0x120   : > { %v878_v52 = vmul.f32 2.0, %v679_v12  ;;  %v775_v19 = vpop.f32.mrf.mxu1  ;;  %3158 = vst [vmem:[#allocation12_spill] sm:$0xff] %v2566_v41  ;;  %v941_v6 = vsub.f32 %v3159_v47, %v877_v0  ;;  %v2574_v45 = vmax.f32 %v940_v46, 0.0  ;;  %v1052_v0 = vmin.f32 %v1050_v16, %v2561_v54  ;;  %v3163_v47 = vld [vmem:[#allocation19_spill] sm:$0xff]  ;;  %v3165_v54 = vld [vmem:[#allocation21_spill] sm:$0xff] }
 0x121   : > { %v681_v61 = vpop.f32.mrf.mxu0  ;;  %v1089_v20 = vmin.f32 %v1087_v50, %v2566_v41 }
 0x122   : > { %v942_v2 = vsub.f32 %v3160_v21, %v878_v52  ;;  %v879_v63 = vmul.f32 2.0, %v681_v61  ;;  %v777_v37 = vpop.f32.mrf.mxu1  ;;  %v1088_v52 = vmin.f32 %v1086_v35, %v2564_v36  ;;  %v2585_v61 = vmax.f32 %v941_v6, 0.0 }
 0x123   : > { %v685_v12 = vpop.f32.mrf.mxu0  ;;  %v908_v21 = vmul.f32 2.0, %v769_v24  ;;  %v1053_v40 = vmin.f32 %v1051_v9, %v2574_v45  ;;  %v3167_v9 = vld [vmem:[#allocation32_spill] sm:$0xff] }
 0x124   : > { %v2580_v34 = vmax.f32 %v942_v2, 0.0  ;;  %v943_v26 = vsub.f32 %v3163_v47, %v879_v63  ;;  %v880_v29 = vmul.f32 2.0, %v685_v12  ;;  %v781_v31 = vpop.f32.mrf.mxu1  ;;  %v909_v63 = vmul.f32 2.0, %v771_v23 }
 0x125   : > { %v687_v46 = vpop.f32.mrf.mxu0  ;;  %v910_v12 = vmul.f32 2.0, %v775_v19  ;;  %v912_v47 = vmul.f32 2.0, %v781_v31  ;;  %v1090_v41 = vmin.f32 %v1088_v52, %v2585_v61 }
 0x126   : > { %3162 = vst [vmem:[#allocation14_spill] sm:$0xff] %v2580_v34  ;;  %v1054_v3 = vmin.f32 %v1052_v0, %v2580_v34  ;;  %v2588_v22 = vmax.f32 %v943_v26, 0.0  ;;  %v944_v16 = vsub.f32 %v3164_v17, %v880_v29  ;;  %v881_v2 = vmul.f32 2.0, %v687_v46  ;;  %v3166_v26 = vld [vmem:[#allocation30_spill] sm:$0xff]  ;;  %v783_v46 = vpop.f32.mrf.mxu1 }
 0x127   : > { %v971_v0 = vsub.f32 %v2353_v13, %v907_v39  ;;  %v972_v34 = vsub.f32 %v3166_v26, %v908_v21  ;;  %v911_v29 = vmul.f32 2.0, %v777_v37  ;;  %v976_v52 = vsub.f32 %v2388_v10, %v912_v47 }
 0x128   : > { %v1063_v35 = vmin.f32 %v1054_v3, %v1068_v25  ;;  %v1091_v50 = vmin.f32 %v1089_v20, %v2588_v22  ;;  %v2593_v6 = vmax.f32 %v944_v16, 0.0  ;;  %v945_v24 = vsub.f32 %v3165_v54, %v881_v2  ;;  %v3168_v54 = vld [vmem:[#allocation33_spill] sm:$0xff] }
 0x129   : > { %v2603_v25 = vmax.f32 %v970_v56, 0.0  ;;  %v973_v20 = vsub.f32 %v3167_v9, %v909_v63  ;;  %v974_v31 = vsub.f32 %v3168_v54, %v910_v12  ;;  %v2610_v21 = vmax.f32 %v971_v0, 0.0 }
 0x12a   : > { %v1100_v17 = vmin.f32 %v1091_v50, %v1105_v57  ;;  %v1065_v23 = vmin.f32 %v1063_v35, %v2572_v8  ;;  %v1055_v19 = vmin.f32 %v1053_v40, %v2593_v6  ;;  %v2601_v3 = vmax.f32 %v945_v24, 0.0 }
 0x12b   : > { %v913_v57 = vmul.f32 2.0, %v783_v46  ;;  %v2613_v40 = vmax.f32 %v972_v34, 0.0  ;;  %v975_v56 = vsub.f32 %v2385_v33, %v911_v29  ;;  %v2616_v63 = vmax.f32 %v973_v20, 0.0 }
 0x12c   : > { %v1067_v39 = vmin.f32 %v1065_v23, %v1055_v19  ;;  %v1102_v13 = vmin.f32 %v1100_v17, %v2576_v7  ;;  %v1092_v37 = vmin.f32 %v1090_v41, %v2601_v3  ;;  %v2618_v12 = vmax.f32 %v974_v31, 0.0 }
 0x12d   : > { %v2622_v35 = vmax.f32 %v976_v52, 0.0  ;;  %v977_v41 = vsub.f32 %v2407_v51, %v913_v57  ;;  %v2627_v34 = vmax.f32 %v975_v56, 0.0 }
 0x12e   : > { %v1104_v16 = vmin.f32 %v1102_v13, %v1092_v37  ;;  %v1069_v2 = vmin.f32 %v1067_v39, %v2603_v25 }
 0x12f   : > { %v2631_v26 = vmax.f32 %v977_v41, 0.0 }
 0x130   : > { %v1106_v10 = vmin.f32 %v1104_v16, %v2610_v21  ;;  %v1070_v47 = vmin.f32 %v2613_v40, %v1069_v2 }
 0x132   : > { %v1107_v50 = vmin.f32 %v2616_v63, %v1106_v10  ;;  %v1071_v24 = vmin.f32 %v2618_v12, %v1070_v47 }
 0x134   : > { %v1108_v33 = vmin.f32 %v2627_v34, %v1107_v50  ;;  %v1072_v0 = vmin.f32 %v2622_v35, %v1071_v24 }
 0x136   : > { %v1073_v29 = vrot.slane %v1072_v0, 4  ;;  %v1109_v46 = vmin.f32 %v2631_v26, %v1108_v33 }
 0x138   : > { %v1074_v17 = vmin.f32 %v1072_v0, %v1073_v29  ;;  %v1110_v23 = vrot.slane %v1109_v46, 4 }
 0x13a   : > { %v1075_v19 = vrot.slane %v1074_v17, 2  ;;  %v1111_v51 = vmin.f32 %v1109_v46, %v1110_v23 }
 0x13c   : > { %v1076_v9 = vmin.f32 %v1074_v17, %v1075_v19  ;;  %v1112_v20 = vrot.slane %v1111_v51, 2 }
 0x13e   : > { %v1077_v54 = vrot.slane %v1076_v9, 1  ;;  %v1113_v31 = vmin.f32 %v1111_v51, %v1112_v20  ;;  %1119 = sbr.rel (%p1610_p2) target bundleno = 335 (0x14f), region = 32 }
 0x140   : > { %v1078_v52 = vmin.f32 %v1076_v9, %v1077_v54  ;;  %v1114_v39 = vrot.slane %v1113_v31, 1 }
 0x142   : > { %v1115_v13 = vmin.f32 %v1113_v31, %v1114_v39 }
 0x143   : > { %v1126_v37 = vlaneseq  ;;  %v1826_v57 = vmov 1966171168  }
 0x144   : > { %v1124_v16 = vunpack.c.l.s4 %v1826_v57  ;;  %v1122_v56 = vcombine.low %v1078_v52, %v1115_v13 }
 0x145   : > { %v1127_v2 = vshrl.u32 %v1126_v37, 7  ;;  %vm1140_vm1 = vcmp.lt.s32.totalorder %v1126_v37, 256 }
 0x146   : > { %v1125_v10 = vunpack.c.0.s8 %v1124_v16 }
 0x148   : > { %v1128_v47 = vsub.s32 %v1125_v10, %v1127_v2 }
 0x14a   : > { %v1129_v41 = vrot.slane %v1122_v56, %v1128_v47 }
 0x14c   : > { %v1136_v50 = vrot.slane %v1129_v41, %v1128_v47 }
 0x14e   : > { %1142 = vst.msk [vmem:[%s2635_s20] sm:$0x3] %vm1140_vm1, %v1136_v50 }
 0x14f PF: > { %p1611_p3 = scmp.le.s32.totalorder %s1799_s15, 0 }
 0x151   : > { %1146 = sbr.rel (%p1611_p3) target bundleno = 356 (0x164), region = 36 }
 0x156   : > { %v1154_v24 = vlaneseq  ;;  %v1827_v33 = vmov 1966171168   ;;  %v1150_v46 = vcombine.low %v1078_v52, %v1115_v13  ;;  %v1147_v51 = vld [vmem:[%s2635_s20] sm:$0x3] }
 0x157   : > { %v1152_v0 = vunpack.c.l.s4 %v1827_v33 }
 0x158   : > { %v1155_v29 = vshrl.u32 %v1154_v24, 7  ;;  %vm1169_vm2 = vcmp.lt.s32.totalorder %v1154_v24, 256 }
 0x159   : > { %v1153_v17 = vunpack.c.0.s8 %v1152_v0 }
 0x15b   : > { %v1156_v23 = vsub.s32 %v1153_v17, %v1155_v29 }
 0x15d   : > { %v1157_v19 = vrot.slane %v1150_v46, %v1156_v23 }
 0x15f   : > { %v1164_v9 = vrot.slane %v1157_v19, %v1156_v23 }
 0x161   : > { %v1166_v20 = vmin.f32 %v1147_v51, %v1164_v9 }
 0x163   : > { %1171 = vst.msk [vmem:[%s2635_s20] sm:$0x3] %vm1169_vm2, %v1166_v20 }
 0x164 PF: > { %v1178_v54 = vmin.f32 %v2390_v44, %v2392_v55  ;;  %v1172_v31 = vmin.f32 %v2340_v32, %v2355_v43  ;;  %v1181_v52 = vmin.f32 %v2413_v14, %v2416_v11  ;;  %v1175_v39 = vmin.f32 %v2361_v42, %v2382_v49  ;;  %v3169_v11 = vld [vmem:[#allocation12_spill] sm:$0xff]  ;;  %v3183_v57 = vld [vmem:[#allocation39_spill] sm:$0xff]  ;;  %v3184_v2 = vld [vmem:[#allocation46_spill] sm:$0xff]  ;;  %s1612_s24 = sshll.u32 %s1799_s15, 8  ;;  %p1613_p4 = scmp.ne.s32.totalorder %s1803_s16, 0 }
 0x165   : > { %v1187_v13 = vmin.f32 %v2443_v60, %v2454_v4  ;;  %v1184_v37 = vmin.f32 %v2420_v38, %v2431_v62  ;;  %v1193_v32 = vmin.f32 %v2478_v58, %v2492_v59  ;;  %v1190_v43 = vmin.f32 %v2464_v5, %v2467_v15  ;;  %v3170_v38 = vld [vmem:[#allocation24_spill] sm:$0xff]  ;;  %v3171_v4 = vld [vmem:[#allocation14_spill] sm:$0xff]  ;;  %v3173_v58 = vld [vmem:[#allocation29_spill] sm:$0xff]  ;;  %s2775_s25 = scalar_lea.vmem (!%p1613_p4), %s1959_s19, %s1612_s24 }
 0x166   : > { %1179 = vmin.xlane.f32.xlu1 %v1178_v54  ;;  %1173 = vmin.xlane.f32.xlu0 %v1172_v31  ;;  %v1199_v42 = vmin.f32 %v2519_v27, %v2530_v28  ;;  %v1196_v49 = vmin.f32 %v2498_v18, %v2506_v48  ;;  %v1205_v44 = vmin.f32 %v2551_v1, %v2564_v36  ;;  %v3172_v15 = vld [vmem:[#allocation34_spill] sm:$0xff]  ;;  %v3174_v18 = vld [vmem:[#allocation31_spill] sm:$0xff]  ;;  %v3178_v1 = vld [vmem:[#allocation36_spill] sm:$0xff] }
 0x167   : > { %v1202_v55 = vmin.f32 %v2538_v30, %v2541_v53  ;;  %v1211_v14 = vmin.f32 %v2574_v45, %v2585_v61  ;;  %v1208_v62 = vmin.f32 %v3170_v38, %v3169_v11  ;;  %v1217_v60 = vmin.f32 %v2593_v6, %v2601_v3  ;;  %v3175_v48 = vld [vmem:[#allocation27_spill] sm:$0xff]  ;;  %v3176_v28 = vld [vmem:[#allocation38_spill] sm:$0xff]  ;;  %v3177_v30 = vld [vmem:[#allocation37_spill] sm:$0xff] }
 0x168   : > { %v1214_v5 = vmin.f32 %v3171_v4, %v2588_v22  ;;  %v1223_v59 = vmin.f32 %v3173_v58, %v3172_v15  ;;  %v1220_v27 = vmin.f32 %v3175_v48, %v3174_v18  ;;  %v1229_v53 = vmin.f32 %v3177_v30, %v3176_v28  ;;  %v3179_v36 = vld [vmem:[#allocation35_spill] sm:$0xff]  ;;  %v3180_v61 = vld [vmem:[#allocation42_spill] sm:$0xff]  ;;  %v3181_v22 = vld [vmem:[#allocation41_spill] sm:$0xff] }
 0x169   : > { %v1226_v45 = vmin.f32 %v3179_v36, %v3178_v1  ;;  %v1235_v6 = vmin.f32 %v3181_v22, %v3180_v61  ;;  %v3182_v3 = vld [vmem:[#allocation40_spill] sm:$0xff]  ;;  %v3185_v56 = vld [vmem:[#allocation45_spill] sm:$0xff]  ;;  %v3187_v41 = vld [vmem:[#allocation43_spill] sm:$0xff]  ;;  %v1253_v23 = vmin.f32 %v2572_v8, %v2576_v7  ;;  %v1259_v20 = vmin.f32 %v2613_v40, %v2616_v63 }
 0x16a   : > { %1182 = vmin.xlane.f32.xlu1 %v1181_v52  ;;  %1176 = vmin.xlane.f32.xlu0 %v1175_v39  ;;  %v1232_v16 = vmin.f32 %v3183_v57, %v3182_v3  ;;  %v1241_v10 = vmin.f32 %v3185_v56, %v3184_v2  ;;  %v3186_v47 = vld [vmem:[#allocation44_spill] sm:$0xff]  ;;  %v3188_v24 = vld [vmem:[#allocation10_spill] sm:$0xff]  ;;  %v3191_v46 = vld [vmem:[#allocation47_spill] sm:$0xff]  ;;  %v1256_v54 = vmin.f32 %v2603_v25, %v2610_v21 }
 0x16b   : > { %v1238_v50 = vmin.f32 %v3187_v41, %v3186_v47  ;;  %v3189_v33 = vld [vmem:[#allocation22_spill] sm:$0xff]  ;;  %v3190_v29 = vld [vmem:[#allocation48_spill] sm:$0xff]  ;;  %v3192_v19 = vld [vmem:[#allocation23_spill] sm:$0xff]  ;;  %v1265_v31 = vmin.f32 %v2622_v35, %v2631_v26  ;;  %v1262_v52 = vmin.f32 %v2618_v12, %v2627_v34 }
 0x16c   : > { %v1247_v0 = vmin.f32 %v3189_v33, %v3188_v24  ;;  %v1244_v17 = vmin.f32 %v3191_v46, %v3190_v29  ;;  %v3193_v51 = vld [vmem:[#allocation11_spill] sm:$0xff] }
 0x16d   : > { %v1250_v9 = vmin.f32 %v3193_v51, %v3192_v19 }
 0x16e   : > { %1188 = vmin.xlane.f32.xlu1 %v1187_v13  ;;  %1185 = vmin.xlane.f32.xlu0 %v1184_v37 }
 0x172   : > { %1194 = vmin.xlane.f32.xlu1 %v1193_v32  ;;  %1191 = vmin.xlane.f32.xlu0 %v1190_v43 }
 0x176   : > { %1200 = vmin.xlane.f32.xlu1 %v1199_v42  ;;  %1197 = vmin.xlane.f32.xlu0 %v1196_v49 }
 0x17a   : > { %1206 = vmin.xlane.f32.xlu1 %v1205_v44  ;;  %1203 = vmin.xlane.f32.xlu0 %v1202_v55 }
 0x17e   : > { %1212 = vmin.xlane.f32.xlu1 %v1211_v14  ;;  %1209 = vmin.xlane.f32.xlu0 %v1208_v62 }
 0x182   : > { %1218 = vmin.xlane.f32.xlu1 %v1217_v60  ;;  %1215 = vmin.xlane.f32.xlu0 %v1214_v5 }
 0x186   : > { %1224 = vmin.xlane.f32.xlu1 %v1223_v59  ;;  %1221 = vmin.xlane.f32.xlu0 %v1220_v27 }
 0x18a   : > { %1230 = vmin.xlane.f32.xlu1 %v1229_v53  ;;  %1227 = vmin.xlane.f32.xlu0 %v1226_v45 }
 0x18e   : > { %1236 = vmin.xlane.f32.xlu1 %v1235_v6  ;;  %1233 = vmin.xlane.f32.xlu0 %v1232_v16 }
 0x192   : > { %1242 = vmin.xlane.f32.xlu1 %v1241_v10  ;;  %1239 = vmin.xlane.f32.xlu0 %v1238_v50 }
 0x196   : > { %1248 = vmin.xlane.f32.xlu1 %v1247_v0  ;;  %1245 = vmin.xlane.f32.xlu0 %v1244_v17 }
 0x19a   : > { %1254 = vmin.xlane.f32.xlu1 %v1253_v23  ;;  %1251 = vmin.xlane.f32.xlu0 %v1250_v9 }
 0x19e   : > { %1260 = vmin.xlane.f32.xlu1 %v1259_v20  ;;  %1257 = vmin.xlane.f32.xlu0 %v1256_v54 }
 0x1a2   : > { %1266 = vmin.xlane.f32.xlu1 %v1265_v31  ;;  %1263 = vmin.xlane.f32.xlu0 %v1262_v52 }
 0x1ef   : > { %v2707_v8 = vpop.xlane.xlu1 %1179  ;;  %v2709_v7 = vpop.xlane.xlu0 %1173 }
 0x1f3   : > { %v2711_v39 = vpop.xlane.xlu1 %1182  ;;  %v2713_v40 = vpop.xlane.xlu0 %1176 }
 0x1f7   : > { %v2715_v25 = vpop.xlane.xlu1 %1188  ;;  %v2717_v21 = vpop.xlane.xlu0 %1185 }
 0x1fb   : > { %v2719_v63 = vpop.xlane.xlu1 %1194  ;;  %v2721_v35 = vpop.xlane.xlu0 %1191 }
 0x1ff   : > { %v2723_v12 = vpop.xlane.xlu1 %1200  ;;  %v2725_v34 = vpop.xlane.xlu0 %1197 }
 0x203   : > { %v2727_v26 = vpop.xlane.xlu1 %1206  ;;  %v2729_v13 = vpop.xlane.xlu0 %1203 }
 0x207   : > { %v2731_v37 = vpop.xlane.xlu1 %1212  ;;  %v2733_v32 = vpop.xlane.xlu0 %1209 }
 0x20b   : > { %v2735_v43 = vpop.xlane.xlu1 %1218  ;;  %v2737_v42 = vpop.xlane.xlu0 %1215 }
 0x20f   : > { %v2739_v49 = vpop.xlane.xlu1 %1224  ;;  %v2741_v44 = vpop.xlane.xlu0 %1221 }
 0x213   : > { %v2743_v55 = vpop.xlane.xlu1 %1230  ;;  %v2745_v14 = vpop.xlane.xlu0 %1227 }
 0x217   : > { %v2747_v11 = vpop.xlane.xlu1 %1236  ;;  %v2749_v38 = vpop.xlane.xlu0 %1233 }
 0x21b   : > { %v2751_v62 = vpop.xlane.xlu1 %1242  ;;  %v2753_v60 = vpop.xlane.xlu0 %1239 }
 0x21f   : > { %v2755_v4 = vpop.xlane.xlu1 %1248  ;;  %v2757_v5 = vpop.xlane.xlu0 %1245 }
 0x223   : > { %v2759_v15 = vpop.xlane.xlu1 %1254  ;;  %v2761_v58 = vpop.xlane.xlu0 %1251 }
 0x227   : > { %v2763_v59 = vpop.xlane.xlu1 %1260  ;;  %v2765_v18 = vpop.xlane.xlu0 %1257  ;;  %1272 = sbr.rel (%p1613_p4) target bundleno = 573 (0x23d), region = 40 }
 0x22b   : > { %v2767_v48 = vpop.xlane.xlu1 %1266  ;;  %v2769_v27 = vpop.xlane.xlu0 %1263 }
 0x22c   : > { %vm1274_vm3 = vcmask 7168  }
 0x22d   : > { %1275 = vst.msk [vmem:[%s2775_s25] sm:$0xff] %vm1274_vm3, %v2709_v7  ;;  %1276 = vst.msk [vmem:[%s2775_s25 + $0x8] sm:$0xff] %vm1274_vm3, %v2713_v40 }
 0x22e   : > { %1277 = vst.msk [vmem:[%s2775_s25 + $0x10] sm:$0xff] %vm1274_vm3, %v2707_v8  ;;  %1278 = vst.msk [vmem:[%s2775_s25 + $0x18] sm:$0xff] %vm1274_vm3, %v2711_v39 }
 0x22f   : > { %1279 = vst.msk [vmem:[%s2775_s25 + $0x20] sm:$0xff] %vm1274_vm3, %v2717_v21  ;;  %1280 = vst.msk [vmem:[%s2775_s25 + $0x28] sm:$0xff] %vm1274_vm3, %v2715_v25 }
 0x230   : > { %1281 = vst.msk [vmem:[%s2775_s25 + $0x30] sm:$0xff] %vm1274_vm3, %v2721_v35  ;;  %1282 = vst.msk [vmem:[%s2775_s25 + $0x38] sm:$0xff] %vm1274_vm3, %v2719_v63 }
 0x231   : > { %1283 = vst.msk [vmem:[%s2775_s25 + $0x40] sm:$0xff] %vm1274_vm3, %v2725_v34  ;;  %1284 = vst.msk [vmem:[%s2775_s25 + $0x48] sm:$0xff] %vm1274_vm3, %v2723_v12 }
 0x232   : > { %1285 = vst.msk [vmem:[%s2775_s25 + $0x50] sm:$0xff] %vm1274_vm3, %v2729_v13  ;;  %1286 = vst.msk [vmem:[%s2775_s25 + $0x58] sm:$0xff] %vm1274_vm3, %v2727_v26 }
 0x233   : > { %1287 = vst.msk [vmem:[%s2775_s25 + $0x60] sm:$0xff] %vm1274_vm3, %v2733_v32  ;;  %1288 = vst.msk [vmem:[%s2775_s25 + $0x68] sm:$0xff] %vm1274_vm3, %v2731_v37 }
 0x234   : > { %1289 = vst.msk [vmem:[%s2775_s25 + $0x70] sm:$0xff] %vm1274_vm3, %v2737_v42  ;;  %1290 = vst.msk [vmem:[%s2775_s25 + $0x78] sm:$0xff] %vm1274_vm3, %v2735_v43 }
 0x235   : > { %1291 = vst.msk [vmem:[%s2775_s25 + $0x80] sm:$0xff] %vm1274_vm3, %v2741_v44  ;;  %1292 = vst.msk [vmem:[%s2775_s25 + $0x88] sm:$0xff] %vm1274_vm3, %v2739_v49 }
 0x236   : > { %1293 = vst.msk [vmem:[%s2775_s25 + $0x90] sm:$0xff] %vm1274_vm3, %v2745_v14  ;;  %1294 = vst.msk [vmem:[%s2775_s25 + $0x98] sm:$0xff] %vm1274_vm3, %v2743_v55 }
 0x237   : > { %1295 = vst.msk [vmem:[%s2775_s25 + $0xa0] sm:$0xff] %vm1274_vm3, %v2749_v38  ;;  %1296 = vst.msk [vmem:[%s2775_s25 + $0xa8] sm:$0xff] %vm1274_vm3, %v2747_v11 }
 0x238   : > { %1297 = vst.msk [vmem:[%s2775_s25 + $0xb0] sm:$0xff] %vm1274_vm3, %v2753_v60  ;;  %1298 = vst.msk [vmem:[%s2775_s25 + $0xb8] sm:$0xff] %vm1274_vm3, %v2751_v62 }
 0x239   : > { %1299 = vst.msk [vmem:[%s2775_s25 + $0xc0] sm:$0xff] %vm1274_vm3, %v2757_v5  ;;  %1300 = vst.msk [vmem:[%s2775_s25 + $0xc8] sm:$0xff] %vm1274_vm3, %v2755_v4 }
 0x23a   : > { %1301 = vst.msk [vmem:[%s2775_s25 + $0xd0] sm:$0xff] %vm1274_vm3, %v2761_v58  ;;  %1302 = vst.msk [vmem:[%s2775_s25 + $0xd8] sm:$0xff] %vm1274_vm3, %v2759_v15 }
 0x23b   : > { %1303 = vst.msk [vmem:[%s2775_s25 + $0xe0] sm:$0xff] %vm1274_vm3, %v2765_v18  ;;  %1304 = vst.msk [vmem:[%s2775_s25 + $0xe8] sm:$0xff] %vm1274_vm3, %v2763_v59 }
 0x23c   : > { %1305 = vst.msk [vmem:[%s2775_s25 + $0xf0] sm:$0xff] %vm1274_vm3, %v2769_v27  ;;  %1306 = vst.msk [vmem:[%s2775_s25 + $0xf8] sm:$0xff] %vm1274_vm3, %v2767_v48 }
 0x23d PF: > { %p1614_p5 = scmp.le.s32.totalorder %s1803_s16, 0 }
 0x23e   : > { %s2877_s9 = scalar_lea.vmem (!%p1614_p5), %s1959_s19, %s1612_s24 }
 0x23f   : > { %1310 = sbr.rel (%p1614_p5) target bundleno = 599 (0x257), region = 44 }
 0x244   : > { %v1312_v28 = vld [vmem:[%s2877_s9] sm:$0xff]  ;;  %vm1376_vm4 = vcmask 7168   ;;  %v1313_v30 = vld [vmem:[%s2877_s9 + $0x8] sm:$0xff]  ;;  %v1314_v53 = vld [vmem:[%s2877_s9 + $0x10] sm:$0xff] }
 0x245   : > { %v1344_v1 = vmin.f32 %v1312_v28, %v2709_v7  ;;  %v1345_v36 = vmin.f32 %v1313_v30, %v2713_v40  ;;  %v1346_v45 = vmin.f32 %v1314_v53, %v2707_v8  ;;  %v1315_v61 = vld [vmem:[%s2877_s9 + $0x18] sm:$0xff]  ;;  %v1316_v22 = vld [vmem:[%s2877_s9 + $0x20] sm:$0xff]  ;;  %v1317_v6 = vld [vmem:[%s2877_s9 + $0x28] sm:$0xff] }
 0x246   : > { %v1347_v3 = vmin.f32 %v1315_v61, %v2711_v39  ;;  %v1348_v57 = vmin.f32 %v1316_v22, %v2717_v21  ;;  %v1349_v16 = vmin.f32 %v1317_v6, %v2715_v25  ;;  %v1318_v2 = vld [vmem:[%s2877_s9 + $0x30] sm:$0xff]  ;;  %v1319_v56 = vld [vmem:[%s2877_s9 + $0x38] sm:$0xff]  ;;  %v1320_v10 = vld [vmem:[%s2877_s9 + $0x40] sm:$0xff] }
 0x247   : > { %1377 = vst.msk [vmem:[%s2877_s9] sm:$0xff] %vm1376_vm4, %v1344_v1  ;;  %1378 = vst.msk [vmem:[%s2877_s9 + $0x8] sm:$0xff] %vm1376_vm4, %v1345_v36  ;;  %v1350_v47 = vmin.f32 %v1318_v2, %v2721_v35  ;;  %v1351_v41 = vmin.f32 %v1319_v56, %v2719_v63  ;;  %v1352_v50 = vmin.f32 %v1320_v10, %v2725_v34  ;;  %v1321_v24 = vld [vmem:[%s2877_s9 + $0x48] sm:$0xff]  ;;  %v1322_v33 = vld [vmem:[%s2877_s9 + $0x50] sm:$0xff] }
 0x248   : > { %1379 = vst.msk [vmem:[%s2877_s9 + $0x10] sm:$0xff] %vm1376_vm4, %v1346_v45  ;;  %v1323_v0 = vld [vmem:[%s2877_s9 + $0x58] sm:$0xff]  ;;  %1380 = vst.msk [vmem:[%s2877_s9 + $0x18] sm:$0xff] %vm1376_vm4, %v1347_v3  ;;  %v1353_v29 = vmin.f32 %v1321_v24, %v2723_v12  ;;  %v1354_v46 = vmin.f32 %v1322_v33, %v2729_v13  ;;  %v1324_v23 = vld [vmem:[%s2877_s9 + $0x60] sm:$0xff] }
 0x249   : > { %1381 = vst.msk [vmem:[%s2877_s9 + $0x20] sm:$0xff] %vm1376_vm4, %v1348_v57  ;;  %1382 = vst.msk [vmem:[%s2877_s9 + $0x28] sm:$0xff] %vm1376_vm4, %v1349_v16  ;;  %v1355_v17 = vmin.f32 %v1323_v0, %v2727_v26  ;;  %v1325_v19 = vld [vmem:[%s2877_s9 + $0x68] sm:$0xff]  ;;  %v1326_v51 = vld [vmem:[%s2877_s9 + $0x70] sm:$0xff]  ;;  %v1356_v9 = vmin.f32 %v1324_v23, %v2733_v32 }
 0x24a   : > { %1383 = vst.msk [vmem:[%s2877_s9 + $0x30] sm:$0xff] %vm1376_vm4, %v1350_v47  ;;  %1384 = vst.msk [vmem:[%s2877_s9 + $0x38] sm:$0xff] %vm1376_vm4, %v1351_v41  ;;  %v1357_v20 = vmin.f32 %v1325_v19, %v2731_v37  ;;  %v1358_v54 = vmin.f32 %v1326_v51, %v2737_v42  ;;  %v1327_v31 = vld [vmem:[%s2877_s9 + $0x78] sm:$0xff]  ;;  %v1328_v52 = vld [vmem:[%s2877_s9 + $0x80] sm:$0xff] }
 0x24b   : > { %1385 = vst.msk [vmem:[%s2877_s9 + $0x40] sm:$0xff] %vm1376_vm4, %v1352_v50  ;;  %v1329_v8 = vld [vmem:[%s2877_s9 + $0x88] sm:$0xff]  ;;  %1386 = vst.msk [vmem:[%s2877_s9 + $0x48] sm:$0xff] %vm1376_vm4, %v1353_v29  ;;  %v1359_v7 = vmin.f32 %v1327_v31, %v2735_v43  ;;  %v1360_v39 = vmin.f32 %v1328_v52, %v2741_v44  ;;  %v1330_v25 = vld [vmem:[%s2877_s9 + $0x90] sm:$0xff] }
 0x24c   : > { %1387 = vst.msk [vmem:[%s2877_s9 + $0x50] sm:$0xff] %vm1376_vm4, %v1354_v46  ;;  %1388 = vst.msk [vmem:[%s2877_s9 + $0x58] sm:$0xff] %vm1376_vm4, %v1355_v17  ;;  %v1361_v40 = vmin.f32 %v1329_v8, %v2739_v49  ;;  %v1331_v21 = vld [vmem:[%s2877_s9 + $0x98] sm:$0xff]  ;;  %v1332_v63 = vld [vmem:[%s2877_s9 + $0xa0] sm:$0xff]  ;;  %v1362_v35 = vmin.f32 %v1330_v25, %v2745_v14 }
 0x24d   : > { %1389 = vst.msk [vmem:[%s2877_s9 + $0x60] sm:$0xff] %vm1376_vm4, %v1356_v9  ;;  %1390 = vst.msk [vmem:[%s2877_s9 + $0x68] sm:$0xff] %vm1376_vm4, %v1357_v20  ;;  %v1363_v12 = vmin.f32 %v1331_v21, %v2743_v55  ;;  %v1364_v34 = vmin.f32 %v1332_v63, %v2749_v38  ;;  %v1333_v26 = vld [vmem:[%s2877_s9 + $0xa8] sm:$0xff]  ;;  %v1334_v13 = vld [vmem:[%s2877_s9 + $0xb0] sm:$0xff] }
 0x24e   : > { %1391 = vst.msk [vmem:[%s2877_s9 + $0x70] sm:$0xff] %vm1376_vm4, %v1358_v54  ;;  %v1335_v37 = vld [vmem:[%s2877_s9 + $0xb8] sm:$0xff]  ;;  %1392 = vst.msk [vmem:[%s2877_s9 + $0x78] sm:$0xff] %vm1376_vm4, %v1359_v7  ;;  %v1365_v32 = vmin.f32 %v1333_v26, %v2747_v11  ;;  %v1366_v43 = vmin.f32 %v1334_v13, %v2753_v60  ;;  %v1336_v49 = vld [vmem:[%s2877_s9 + $0xc0] sm:$0xff] }
 0x24f   : > { %1393 = vst.msk [vmem:[%s2877_s9 + $0x80] sm:$0xff] %vm1376_vm4, %v1360_v39  ;;  %1394 = vst.msk [vmem:[%s2877_s9 + $0x88] sm:$0xff] %vm1376_vm4, %v1361_v40  ;;  %v1367_v42 = vmin.f32 %v1335_v37, %v2751_v62  ;;  %v1337_v44 = vld [vmem:[%s2877_s9 + $0xc8] sm:$0xff]  ;;  %v1338_v55 = vld [vmem:[%s2877_s9 + $0xd0] sm:$0xff]  ;;  %v1368_v14 = vmin.f32 %v1336_v49, %v2757_v5 }
 0x250   : > { %1395 = vst.msk [vmem:[%s2877_s9 + $0x90] sm:$0xff] %vm1376_vm4, %v1362_v35  ;;  %1396 = vst.msk [vmem:[%s2877_s9 + $0x98] sm:$0xff] %vm1376_vm4, %v1363_v12  ;;  %v1369_v11 = vmin.f32 %v1337_v44, %v2755_v4  ;;  %v1370_v38 = vmin.f32 %v1338_v55, %v2761_v58  ;;  %v1339_v62 = vld [vmem:[%s2877_s9 + $0xd8] sm:$0xff]  ;;  %v1340_v60 = vld [vmem:[%s2877_s9 + $0xe0] sm:$0xff] }
 0x251   : > { %1397 = vst.msk [vmem:[%s2877_s9 + $0xa0] sm:$0xff] %vm1376_vm4, %v1364_v34  ;;  %v1341_v28 = vld [vmem:[%s2877_s9 + $0xe8] sm:$0xff]  ;;  %1398 = vst.msk [vmem:[%s2877_s9 + $0xa8] sm:$0xff] %vm1376_vm4, %v1365_v32  ;;  %v1371_v5 = vmin.f32 %v1339_v62, %v2759_v15  ;;  %v1372_v4 = vmin.f32 %v1340_v60, %v2765_v18  ;;  %v1342_v30 = vld [vmem:[%s2877_s9 + $0xf0] sm:$0xff] }
 0x252   : > { %1399 = vst.msk [vmem:[%s2877_s9 + $0xb0] sm:$0xff] %vm1376_vm4, %v1366_v43  ;;  %1400 = vst.msk [vmem:[%s2877_s9 + $0xb8] sm:$0xff] %vm1376_vm4, %v1367_v42  ;;  %v1373_v58 = vmin.f32 %v1341_v28, %v2763_v59  ;;  %v1343_v53 = vld [vmem:[%s2877_s9 + $0xf8] sm:$0xff]  ;;  %v1374_v1 = vmin.f32 %v1342_v30, %v2769_v27 }
 0x253   : > { %1401 = vst.msk [vmem:[%s2877_s9 + $0xc0] sm:$0xff] %vm1376_vm4, %v1368_v14  ;;  %1402 = vst.msk [vmem:[%s2877_s9 + $0xc8] sm:$0xff] %vm1376_vm4, %v1369_v11  ;;  %v1375_v36 = vmin.f32 %v1343_v53, %v2767_v48 }
 0x254   : > { %1403 = vst.msk [vmem:[%s2877_s9 + $0xd0] sm:$0xff] %vm1376_vm4, %v1370_v38  ;;  %1404 = vst.msk [vmem:[%s2877_s9 + $0xd8] sm:$0xff] %vm1376_vm4, %v1371_v5 }
 0x255   : > { %1405 = vst.msk [vmem:[%s2877_s9 + $0xe0] sm:$0xff] %vm1376_vm4, %v1372_v4  ;;  %1406 = vst.msk [vmem:[%s2877_s9 + $0xe8] sm:$0xff] %vm1376_vm4, %v1373_v58 }
 0x256   : > { %1407 = vst.msk [vmem:[%s2877_s9 + $0xf0] sm:$0xff] %vm1376_vm4, %v1374_v1  ;;  %1408 = vst.msk [vmem:[%s2877_s9 + $0xf8] sm:$0xff] %vm1376_vm4, %v1375_v36 }
 0x257 PF: > { %s1617_s15 = sshll.u32 %s1807_s17, 3  ;;  %s1431_s19 = sshll.u32 %s2635_s20, 4  ;;  %s1432_s19 = int_to_ptr.vmem [resolvable:$true] %s1431_s19 }
 0x258   : > { %s1427_s16 = sadd.s32 %s1617_s15, %s1936_s8  ;;  %s3194_s5 = sand.u32 1, %s1791_s13  }
 0x259   : > { %s1618_s23 = sshll.u32 %s1427_s16, 4  ;;  %s1410_s11 = scalar_lea.sflag [#allocation3], %s3194_s5 }
 0x25a   : > { %s1429_s4 = scalar_lea.hbm %s3063_s2, %s1618_s23  ;;  %s1715_s26 = scalar_lea.vmem %s1432_s19, 32 }
 0x25b   : > { %p1716_p8 = scmp.ne.s32.totalorder %s1432_s19, %s1715_s26  ;;  %s1828_s10 = smov [#allocation2]  }
 0x25c   : > { %s1719_s22 = sshll.u32 %s1828_s10, 4  ;;  %s1720_s22 = int_to_ptr.vmem [resolvable:$false] %s1719_s22 }
 0x25d   : > { %p1717_p9 = pnand %p1716_p8, %p1911_p6  ;;  %s1721_s7 = scalar_lea.vmem %s1720_s22, 64 }
 0x25e   : > { %p1722_p11 = scmp.lt.s32.totalorder %s1432_s19, %s1720_s22  ;;  %p1723_p12 = scmp.lt.s32.totalorder %s1721_s7, %s1715_s26 }
 0x25f   : > { %p1718_p10 = pneg %p1717_p9 }
 0x260   : > { %p1724_p13 = por %p1723_p12, %p1722_p11 }
 0x262   : > { %p1725_p0 = pnand %p1724_p13, %p1718_p10 }
 0x264   : > { %1728 = shalt.err (!%p1725_p0)
}
 0x265   : > { %s1729_s17 = scalar_lea.hbm %s1429_s4, 32  ;;  %s1733_s24 = scalar_lea.hbm %s3063_s2, 256 }
 0x266   : > { %p1730_p1 = scmp.ne.s32.totalorder %s1429_s4, %s1729_s17  ;;  %p1734_p4 = scmp.lt.s32.totalorder %s1429_s4, %s3063_s2 }
 0x267   : > { %p1735_p5 = scmp.lt.s32.totalorder %s1733_s24, %s1729_s17 }
 0x268   : > { %p1731_p2 = pnand %p1730_p1, %p1911_p6 }
 0x269   : > { %p1736_p8 = por %p1735_p5, %p1734_p4 }
 0x26a   : > { %p1732_p3 = pneg %p1731_p2 }
 0x26c   : > { %p1737_p9 = pnand %p1736_p8, %p1732_p3 }
 0x26e   : > { %1740 = shalt.err (!%p1737_p9)
}
 0x26f   : > { %1625 = dma.vmem_to_hbm [thread:$0]  (%p1911_p6), %s1432_s19, 32, %s1429_s4, %s1410_s11  }
 0x270 PF: > { %p1631_p10 = scmp.ge.s32.totalorder %s1823_s21, 2  ;;  %s1446_s15 = sand.u32 1, %s1787_s12  }
 0x271   : > { %s1447_s16 = scalar_lea.sflag [#allocation3], %s1446_s15 }
 0x272   : > { %p1628_p11 = pnand %p1631_p10, %p1918_p7 }
 0x274   : > { %p1629_p12 = pneg %p1628_p11 }
 0x276   : > { %1782 = dma.done.wait (%p1629_p12), %s1447_s16, 32  }
 0x277   : > { %1784 = vsyncadd (%p1629_p12), %s1447_s16, 4294967264  ;;  %s17_s21 = sadd.s32 1, %s1823_s21   ;;  %s3195_s16 = sld [smem:[#allocation5_spill]] }
 0x278   : > { %p14_p13 = scmp.ge.s32.totalorder %s17_s21, 26   ;;  %s3196_s17 = sld [smem:[#allocation6_spill]] }
 0x279   : > { %s3197_s27 = sld [smem:[#allocation7_spill]]  ;;  %s3200_s12 = smov %s1791_s13 }
 0x27a   : > { %s3198_s19 = sld [smem:[#allocation8_spill]]  ;;  %s3201_s13 = smov %s1795_s14 }
 0x27b   : > { %s3199_s20 = sld [smem:[#allocation9_spill]]  ;;  %s3202_s14 = smov %s1932_s6 }
 0x27c   : > { %s3203_s15 = smov %s1811_s18  ;;  %16 = sbr.rel (!%p14_p13) target bundleno = 6 (0x6), region = 96 }
 0x27f   : > { %s3204_s18 = smov %s3197_s27 }
 0x281   :  { %1460 = vsyncpa [#allocation3], 1 }
 0x282   :  { %1462 = vsyncpa [#allocation3 + $0x1], 1 }

</bundles_post_ra>
